<compile_context>
chip_gen: v5e
topology: v5e:2x2
jax: 0.10.0
libtpu: 0.0.40
codegen_flags: <defaults>
</compile_context>

<pallas_src>
from functools import partial

import jax
import jax.numpy as jnp
from jax.experimental import pallas as pl
from jax.experimental.pallas import tpu as pltpu


def _round_up(a: int, b: int) -> int:
    return ((a + b - 1) // b) * b


def _ffn_kernel(seed_ref, x_ref, w1_ref, b1_ref, w2_ref, b2_ref, o_ref, *,
                keep_prob: float, block_m: int, compute_dtype, epilogue_dtype):
    """Fused FFN tile: (x @ w1 + b1) -> gelu -> dropout(seed) -> (@ w2 + b2).

    The 1/keep_prob rescale is pre-folded into w2 by the wrapper, so dropout
    here only zeroes elements.
    """
    # First matmul: cast the f32 activation tile to bf16 in-kernel (no extra
    # wrapper pass over x in HBM), f32 accumulation on the MXU.
    xb = x_ref[...].astype(compute_dtype)
    h = jnp.dot(xb, w1_ref[...], preferred_element_type=jnp.float32)
    h = (h + b1_ref[...]).astype(epilogue_dtype)      # [TM, H] + [1, H]

    # GELU (tanh approximation -> EUP slot).
    g = jax.nn.gelu(h, approximate=True)

    # Deterministic dropout via a stateless position hash of
    # (seed, global_row, col): bit-exact on replay, tiling-invariant.
    # Avalanche is done on rank-1 vectors; only ~6 ops touch the full tile.
    if keep_prob < 1.0:
        tm, hd = g.shape
        seed_u = seed_ref[0].astype(jnp.uint32)
        row_base = (pl.program_id(0) * block_m).astype(jnp.uint32)

        row = (jax.lax.broadcasted_iota(jnp.int32, (tm, 1), 0)
               .astype(jnp.uint32) + row_base)                      # [TM, 1]
        col = (jax.lax.broadcasted_iota(jnp.int32, (1, hd), 1)
               .astype(jnp.uint32))                                 # [1,  H]

        # Rank-1 mixing (cheap: TM or H elements, not TM*H).
        rh = (row + seed_u * jnp.uint32(0xC2B2AE3D)) * jnp.uint32(0x9E3779B1)
        rh = rh ^ (rh >> 16)
        rh = rh * jnp.uint32(0x7FEB352D)
        ch = (col ^ (seed_u * jnp.uint32(0x27D4EB2F))) * jnp.uint32(0x85EBCA77)
        ch = ch ^ (ch >> 16)
        ch = ch * jnp.uint32(0x846CA68B)

        # Full [TM, H] part: combine + short finalizer + compare + select.
        u = rh ^ ch
        u = u ^ (u >> 15)
        u = u * jnp.uint32(0x2C1B3C6D)
        thresh = jnp.uint32(min(int(keep_prob * (2 ** 32)), 2 ** 32 - 1))
        g = jnp.where(u < thresh, g, jnp.zeros((), g.dtype))

    # Second matmul: bf16 LHS (halves the live [TM,H] intermediate), f32 acc.
    g = g.astype(w2_ref.dtype)
    out = jnp.dot(g, w2_ref[...], preferred_element_type=jnp.float32)
    out = out + b2_ref[...]                           # [TM, D] + [1, D]
    o_ref[...] = out.astype(o_ref.dtype)


def ffn_pallas(x, w1, b1, w2, b2, *, seed, drop_p=0.1, block_m=None,
               compute_dtype=jnp.bfloat16, epilogue_dtype=jnp.float32):
    """x: [B, S, D].  Returns [B, S, D] in x.dtype."""
    B, S, D = x.shape
    H = w1.shape[1]
    assert D % 128 == 0 and H % 128 == 0, (
        "Pad feature dims D/H to multiples of 128 lanes for lane-dense "
        "MXU passes and unmasked stores.")
    M = B * S
    out_dtype = x.dtype

    # Per-generation VMEM budget (v7x: 64 MiB/TC, v5e/v6e: 128 MiB).
    try:
        vmem_cap = int(pltpu.get_tpu_info().vmem_capacity_bytes)
    except Exception:
        vmem_cap = 64 * 1024 * 1024
    vmem_limit = max(32 * 1024 * 1024, int(vmem_cap * 0.85))

    # Per-generation default tile: bigger tiles amortize per-step overhead
    # where VMEM allows (v5e/v6e), smaller on v7x's halved VMEM.
    if block_m is None:
        block_m = 512 if vmem_cap >= (96 << 20) else 256

    # M tile: multiple of 128 rows (dense bf16 sublane packing, full MXU
    # passes, unmasked output stores).  Pad M so the grid divides evenly.
    tm = min(int(block_m), _round_up(M, 128))
    tm = max(128, _round_up(tm, 128))
    M_pad = _round_up(M, tm)
    # Megacore: prefer an even number of grid steps so both TCs get work.
    steps = M_pad // tm
    if steps > 1 and steps % 2 == 1 and tm >= 256 and tm % 256 == 0:
        tm //= 2
        M_pad = _round_up(M, tm)
    grid = (M_pad // tm,)

    keep_prob = 1.0 - float(drop_p)

    # x stays in its input dtype (f32): the bf16 cast happens in-kernel so
    # HBM sees 4 B/elt once instead of 4+2+2.
    x2 = x.reshape(M, D)
    if M_pad != M:
        x2 = jnp.pad(x2, ((0, M_pad - M), (0, 0)))
    w1c = w1.astype(compute_dtype)
    # Fold the dropout 1/keep_prob rescale into w2 (one tiny weight pass,
    # removes a per-element multiply in the kernel).
    w2_eff = w2 if keep_prob >= 1.0 else w2 * (1.0 / keep_prob)
    w2c = w2_eff.astype(compute_dtype)
    b1_2d = b1.reshape(1, H).astype(jnp.float32)
    b2_2d = b2.reshape(1, D).astype(jnp.float32)
    seed_arr = jnp.asarray([seed], dtype=jnp.int32)

    kernel = partial(_ffn_kernel, keep_prob=keep_prob, block_m=tm,
                     compute_dtype=compute_dtype, epilogue_dtype=epilogue_dtype)

    # Deeper activation buffering only when per-step compute is tiny
    # (memory/latency-bound small-D/H regime); 2 suffices when MXU dominates.
    per_step_flops = 4 * tm * D * H
    act_buffers = 3 if per_step_flops < (2 << 31) else 2

    w_itemsize = jnp.dtype(compute_dtype).itemsize
    flops = 4 * M_pad * D * H                              # two matmuls
    bytes_accessed = (M_pad * D * x2.dtype.itemsize        # x (f32 in)
                      + D * H * w_itemsize                 # w1
                      + H * D * w_itemsize                 # w2
                      + (H + D) * 4                        # biases
                      + M_pad * D * jnp.dtype(out_dtype).itemsize)  # out

    def _run(use_pipeline_mode):
        def const_spec(shape):
            if use_pipeline_mode:
                # Constant block index -> VMEM resident; single buffer only.
                return pl.BlockSpec(shape, lambda i, s: (0, 0),
                                    pipeline_mode=pl.Buffered(1))
            return pl.BlockSpec(shape, lambda i, s: (0, 0))

        if use_pipeline_mode:
            x_spec = pl.BlockSpec((tm, D), lambda i, s: (i, 0),
                                  pipeline_mode=pl.Buffered(act_buffers))
        else:
            x_spec = pl.BlockSpec((tm, D), lambda i, s: (i, 0))

        return pl.pallas_call(
            kernel,
            out_shape=jax.ShapeDtypeStruct((M_pad, D), out_dtype),
            grid_spec=pltpu.PrefetchScalarGridSpec(
                num_scalar_prefetch=1,                 # seed lands in SMEM
                grid=grid,
                in_specs=[
                    x_spec,                            # streamed activations
                    const_spec((D, H)),                # w1 (resident)
                    const_spec((1, H)),                # b1 (resident)
                    const_spec((H, D)),                # w2 (resident, prescaled)
                    const_spec((1, D)),                # b2 (resident)
                ],
                out_specs=pl.BlockSpec((tm, D), lambda i, s: (i, 0)),
            ),
            compiler_params=pltpu.CompilerParams(
                dimension_semantics=("parallel",),     # megacore-shardable M
                vmem_limit_bytes=vmem_limit,
            ),
            cost_estimate=pl.CostEstimate(
                flops=flops,
                transcendentals=M_pad * H,             # tanh in GELU
                bytes_accessed=bytes_accessed,
            ),
        )(seed_arr, x2, w1c, b1_2d, w2c, b2_2d)

    try:
        out = _run(True)
    except Exception:
        # Fallback if this JAX build rejects pipeline_mode on BlockSpec.
        out = _run(False)
    return out[:M].reshape(B, S, D)


class FeedForwardNet:
    """The `net` wrapped by Deterministic: Linear -> GELU -> Dropout -> Linear."""

    def __init__(self, dim, hidden, drop_p=0.1, block_m=None):
        self.drop_p = drop_p
        self.block_m = block_m
        k1, k2 = jax.random.split(jax.random.PRNGKey(1234))
        # Deterministic synthetic parameter init (no checkpoint).
        self.w1 = (jax.random.normal(k1, (dim, hidden), jnp.float32)
                   * (1.0 / jnp.sqrt(dim)))
        self.b1 = jnp.zeros((hidden,), jnp.float32)
        self.w2 = (jax.random.normal(k2, (hidden, dim), jnp.float32)
                   * (1.0 / jnp.sqrt(hidden)))
        self.b2 = jnp.zeros((dim,), jnp.float32)

    def __call__(self, x, *, seed):
        return ffn_pallas(x, self.w1, self.b1, self.w2, self.b2,
                          seed=seed, drop_p=self.drop_p, block_m=self.block_m)


class Deterministic:
    """JAX analogue of the PyTorch Deterministic wrapper.

    torch.get_rng_state()/fork_rng are replaced by explicitly storing the
    integer seed that drives the in-kernel dropout hash and replaying it.
    """

    def __init__(self, net):
        self.net = net
        self.recorded_seed = None   # plays the role of cpu_state
        # TODO(synk): CUDA per-device RNG state capture (get_device_states /
        # set_device_states) has no JAX equivalent; explicit seeds cover it.

    def record_rng(self, seed):
        self.recorded_seed = int(seed)

    def __call__(self, x, *, seed=0, record_rng=False, set_rng=False):
        if record_rng:
            self.record_rng(seed)
        if not set_rng:
            return self.net(x, seed=seed)
        assert self.recorded_seed is not None, "set_rng=True before record_rng"
        return self.net(x, seed=self.recorded_seed)


if __name__ == "__main__":
    # Lane-aligned small shapes: D, H multiples of 128; M = B*S = 256.
    B, S, D, H = 2, 128, 128, 256

    x = jax.random.normal(jax.random.PRNGKey(0), (B, S, D), jnp.float32)

    net = FeedForwardNet(D, H, drop_p=0.1, block_m=128)   # grid over M = 2 tiles
    det = Deterministic(net)

    # Forward with RNG recording (as done on the "forward" pass of RevNet).
    y_fwd = jax.block_until_ready(det(x, seed=42, record_rng=True))

    # Replay with the recorded RNG state (backward recomputation) — must
    # reproduce the exact same dropout mask/output.
    y_replay = jax.block_until_ready(det(x, set_rng=True))

    assert y_fwd.shape == (B, S, D)
    assert jnp.allclose(y_fwd, y_replay), "RNG replay mismatch"

    # Dropout mask is tiling-invariant (position-hashed): a different M tile
    # size must give the same result for the same seed.
    y_tm256 = jax.block_until_ready(
        ffn_pallas(x, net.w1, net.b1, net.w2, net.b2,
                   seed=42, drop_p=net.drop_p, block_m=256))
    assert jnp.allclose(y_fwd, y_tm256), "dropout mask not tiling-invariant"

    print("KERNEL_OK")
</pallas_src>

<mosaic_0001>
module attributes {stable_mosaic.version = 11 : i64} {
  func.func @_ffn_kernel(%arg0: i32, %arg1: memref<1xi32, #tpu.memory_space<smem>>, %arg2: memref<128x128xf32, #tpu.memory_space<vmem>>, %arg3: memref<128x256xbf16, #tpu.memory_space<vmem>>, %arg4: memref<1x256xf32, #tpu.memory_space<vmem>>, %arg5: memref<256x128xbf16, #tpu.memory_space<vmem>>, %arg6: memref<1x128xf32, #tpu.memory_space<vmem>>, %arg7: memref<128x128xf32, #tpu.memory_space<vmem>>) attributes {dimension_semantics = [#tpu.dimension_semantics<parallel>], iteration_bounds = array<i64: 2>, scalar_prefetch = 1 : i64, scratch_operands = 0 : i64, tpu.core_type = #tpu.core_type<tc>, window_params = [{transform_indices = @transform_0, window_bounds = array<i64: 128, 128>}, {pipeline_mode = #tpu.pipeline_mode<synchronous>, transform_indices = @transform_1, window_bounds = array<i64: 128, 256>}, {pipeline_mode = #tpu.pipeline_mode<synchronous>, transform_indices = @transform_2, window_bounds = array<i64: 1, 256>}, {pipeline_mode = #tpu.pipeline_mode<synchronous>, transform_indices = @transform_3, window_bounds = array<i64: 256, 128>}, {pipeline_mode = #tpu.pipeline_mode<synchronous>, transform_indices = @transform_4, window_bounds = array<i64: 1, 128>}, {transform_indices = @transform_5, window_bounds = array<i64: 128, 128>}]} {
    %c0 = arith.constant 0 : index
    %c0_0 = arith.constant 0 : index
    %0 = vector.load %arg2[%c0, %c0_0] : memref<128x128xf32, #tpu.memory_space<vmem>>, vector<128x128xf32>
    %1 = arith.truncf %0 : vector<128x128xf32> to vector<128x128xbf16>
    %c0_1 = arith.constant 0 : index
    %c0_2 = arith.constant 0 : index
    %2 = vector.load %arg3[%c0_1, %c0_2] : memref<128x256xbf16, #tpu.memory_space<vmem>>, vector<128x256xbf16>
    %cst = arith.constant dense<0.000000e+00> : vector<128x256xf32>
    %3 = tpu.matmul %1, %2, %cst {dimension_numbers = #tpu.dot_dimension_numbers<[1], [0], [0], [1], [0, 0, 1, 1], [], []>} : vector<128x128xbf16>, vector<128x256xbf16>, vector<128x256xf32> -> vector<128x256xf32>
    %c0_3 = arith.constant 0 : index
    %c0_4 = arith.constant 0 : index
    %4 = vector.load %arg4[%c0_3, %c0_4] : memref<1x256xf32, #tpu.memory_space<vmem>>, vector<1x256xf32>
    %5 = vector.broadcast %4 : vector<1x256xf32> to vector<128x256xf32>
    %6 = arith.addf %3, %5 : vector<128x256xf32>
    %7 = arith.mulf %6, %6 : vector<128x256xf32>
    %8 = arith.mulf %6, %7 : vector<128x256xf32>
    %cst_5 = arith.constant 4.471500e-02 : f32
    %9 = vector.broadcast %cst_5 : f32 to vector<128x256xf32>
    %10 = arith.mulf %9, %8 : vector<128x256xf32>
    %11 = arith.addf %6, %10 : vector<128x256xf32>
    %cst_6 = arith.constant 0.797884583 : f32
    %12 = vector.broadcast %cst_6 : f32 to vector<128x256xf32>
    %13 = arith.mulf %12, %11 : vector<128x256xf32>
    %14 = math.tanh %13 : vector<128x256xf32>
    %cst_7 = arith.constant 1.000000e+00 : f32
    %15 = vector.broadcast %cst_7 : f32 to vector<128x256xf32>
    %16 = arith.addf %15, %14 : vector<128x256xf32>
    %cst_8 = arith.constant 5.000000e-01 : f32
    %17 = vector.broadcast %cst_8 : f32 to vector<128x256xf32>
    %18 = arith.mulf %17, %16 : vector<128x256xf32>
    %19 = arith.mulf %6, %18 : vector<128x256xf32>
    %c0_9 = arith.constant 0 : index
    %20 = memref.load %arg1[%c0_9] : memref<1xi32, #tpu.memory_space<smem>>
    %c128_i32 = arith.constant 128 : i32
    %21 = arith.muli %arg0, %c128_i32 : i32
    %22 = tpu.iota {dimensions = array<i32: 0>} : vector<128x1xi32>
    %23 = vector.broadcast %21 : i32 to vector<128x1xi32>
    %24 = arith.addi %22, %23 : vector<128x1xi32>
    %25 = tpu.iota {dimensions = array<i32: 1>} : vector<1x256xi32>
    %c-1028477379_i32 = arith.constant -1028477379 : i32
    %26 = arith.muli %20, %c-1028477379_i32 : i32
    %27 = vector.broadcast %26 : i32 to vector<128x1xi32>
    %28 = arith.addi %24, %27 : vector<128x1xi32>
    %c-1640531535_i32 = arith.constant -1640531535 : i32
    %29 = vector.broadcast %c-1640531535_i32 : i32 to vector<128x1xi32>
    %30 = arith.muli %28, %29 : vector<128x1xi32>
    %c16_i32 = arith.constant 16 : i32
    %31 = vector.broadcast %c16_i32 : i32 to vector<128x1xi32>
    %32 = arith.shrui %30, %31 : vector<128x1xi32>
    %33 = arith.xori %30, %32 : vector<128x1xi32>
    %c2146121005_i32 = arith.constant 2146121005 : i32
    %34 = vector.broadcast %c2146121005_i32 : i32 to vector<128x1xi32>
    %35 = arith.muli %33, %34 : vector<128x1xi32>
    %c668265263_i32 = arith.constant 668265263 : i32
    %36 = arith.muli %20, %c668265263_i32 : i32
    %37 = vector.broadcast %36 : i32 to vector<1x256xi32>
    %38 = arith.xori %25, %37 : vector<1x256xi32>
    %c-2048144777_i32 = arith.constant -2048144777 : i32
    %39 = vector.broadcast %c-2048144777_i32 : i32 to vector<1x256xi32>
    %40 = arith.muli %38, %39 : vector<1x256xi32>
    %c16_i32_10 = arith.constant 16 : i32
    %41 = vector.broadcast %c16_i32_10 : i32 to vector<1x256xi32>
    %42 = arith.shrui %40, %41 : vector<1x256xi32>
    %43 = arith.xori %40, %42 : vector<1x256xi32>
    %c-2073254261_i32 = arith.constant -2073254261 : i32
    %44 = vector.broadcast %c-2073254261_i32 : i32 to vector<1x256xi32>
    %45 = arith.muli %43, %44 : vector<1x256xi32>
    %46 = vector.broadcast %35 : vector<128x1xi32> to vector<128x256xi32>
    %47 = vector.broadcast %45 : vector<1x256xi32> to vector<128x256xi32>
    %48 = arith.xori %46, %47 : vector<128x256xi32>
    %c15_i32 = arith.constant 15 : i32
    %49 = vector.broadcast %c15_i32 : i32 to vector<128x256xi32>
    %50 = arith.shrui %48, %49 : vector<128x256xi32>
    %51 = arith.xori %48, %50 : vector<128x256xi32>
    %c739982445_i32 = arith.constant 739982445 : i32
    %52 = vector.broadcast %c739982445_i32 : i32 to vector<128x256xi32>
    %53 = arith.muli %51, %52 : vector<128x256xi32>
    %c-429496730_i32 = arith.constant -429496730 : i32
    %54 = vector.broadcast %c-429496730_i32 : i32 to vector<128x256xi32>
    %55 = arith.cmpi ult, %53, %54 : vector<128x256xi32>
    %cst_11 = arith.constant 0.000000e+00 : f32
    %56 = vector.broadcast %cst_11 : f32 to vector<128x256xf32>
    %57 = arith.select %55, %19, %56 : vector<128x256xi1>, vector<128x256xf32>
    %58 = arith.truncf %57 : vector<128x256xf32> to vector<128x256xbf16>
    %c0_12 = arith.constant 0 : index
    %c0_13 = arith.constant 0 : index
    %59 = vector.load %arg5[%c0_12, %c0_13] : memref<256x128xbf16, #tpu.memory_space<vmem>>, vector<256x128xbf16>
    %cst_14 = arith.constant dense<0.000000e+00> : vector<128x128xf32>
    %60 = tpu.matmul %58, %59, %cst_14 {dimension_numbers = #tpu.dot_dimension_numbers<[1], [0], [0], [1], [0, 0, 1, 1], [], []>} : vector<128x256xbf16>, vector<256x128xbf16>, vector<128x128xf32> -> vector<128x128xf32>
    %c0_15 = arith.constant 0 : index
    %c0_16 = arith.constant 0 : index
    %61 = vector.load %arg6[%c0_15, %c0_16] : memref<1x128xf32, #tpu.memory_space<vmem>>, vector<1x128xf32>
    %62 = vector.broadcast %61 : vector<1x128xf32> to vector<128x128xf32>
    %63 = arith.addf %60, %62 : vector<128x128xf32>
    %c0_17 = arith.constant 0 : index
    %c0_18 = arith.constant 0 : index
    %64 = vector.load %arg7[%c0_17, %c0_18] : memref<128x128xf32, #tpu.memory_space<vmem>>, vector<128x128xf32>
    tpu.vector_store %arg7[%c0_17, %c0_18], %63 {strides = array<i32>} : memref<128x128xf32, #tpu.memory_space<vmem>>, vector<128x128xf32>,
    return
  }
  func.func @transform_0(%arg0: i32, %arg1: memref<1xi32, #tpu.memory_space<smem>>) -> (i32, i32) {
    %c0_i32 = arith.constant 0 : i32
    %c0_i32_0 = arith.constant 0 : i32
    return %arg0, %c0_i32 : i32, i32
  }
  func.func @transform_1(%arg0: i32, %arg1: memref<1xi32, #tpu.memory_space<smem>>) -> (i32, i32) {
    %c0_i32 = arith.constant 0 : i32
    %c0_i32_0 = arith.constant 0 : i32
    %c0_i32_1 = arith.constant 0 : i32
    return %c0_i32, %c0_i32_0 : i32, i32
  }
  func.func @transform_2(%arg0: i32, %arg1: memref<1xi32, #tpu.memory_space<smem>>) -> (i32, i32) {
    %c0_i32 = arith.constant 0 : i32
    %c0_i32_0 = arith.constant 0 : i32
    %c0_i32_1 = arith.constant 0 : i32
    return %c0_i32, %c0_i32_0 : i32, i32
  }
  func.func @transform_3(%arg0: i32, %arg1: memref<1xi32, #tpu.memory_space<smem>>) -> (i32, i32) {
    %c0_i32 = arith.constant 0 : i32
    %c0_i32_0 = arith.constant 0 : i32
    %c0_i32_1 = arith.constant 0 : i32
    return %c0_i32, %c0_i32_0 : i32, i32
  }
  func.func @transform_4(%arg0: i32, %arg1: memref<1xi32, #tpu.memory_space<smem>>) -> (i32, i32) {
    %c0_i32 = arith.constant 0 : i32
    %c0_i32_0 = arith.constant 0 : i32
    %c0_i32_1 = arith.constant 0 : i32
    return %c0_i32, %c0_i32_0 : i32, i32
  }
  func.func @transform_5(%arg0: i32, %arg1: memref<1xi32, #tpu.memory_space<smem>>) -> (i32, i32) {
    %c0_i32 = arith.constant 0 : i32
    %c0_i32_0 = arith.constant 0 : i32
    return %arg0, %c0_i32 : i32, i32
  }
}

</mosaic_0001>

<bundles_post_ra>
// kernel: tpu_custom_call.1
= control target key start
LH: loop header
LB: loop body
LE: loop exit
PB: predicated region body
PF: predicated region fallthrough
CT: control target
= control target key end

     0   :  { %s2825_s0 = inlined_call_operand.<no memory space> [shape: s32[1], index: 0, kind: input, shape index: {}]   ;;  %s2826_s1 = inlined_call_operand.hbm [shape: f32[256,128], index: 1, kind: input, shape index: {}]   ;;  %s2827_s2 = inlined_call_operand.hbm [shape: bf16[128,256], index: 2, kind: input, shape index: {}]   ;;  %s2828_s3 = inlined_call_operand.vmem [shape: f32[1,256], index: 3, kind: input, shape index: {}]   ;;  %s2829_s4 = inlined_call_operand.hbm [shape: bf16[256,128], index: 4, kind: input, shape index: {}]   ;;  %s2830_s5 = inlined_call_operand.vmem [shape: f32[1,128], index: 5, kind: input, shape index: {}]   ;;  %s2831_s6 = inlined_call_operand.hbm [shape: f32[256,128], index: 6, kind: output, shape index: {}]  }
   0x1   :  { %11 = sst [smem:[#allocation3]] %s2825_s0 }
   0x2   :  { %12 = vsyncpa [#allocation5], 0 }
   0x3   :  { %14 = vsyncpa [#allocation5 + $0x1], 0 }
   0x4   :  { %15 = vsyncpa [#allocation8], 0 }
   0x5   :  { %16 = vsyncpa [#allocation6], 0 }
   0x6   :  { %18 = vsyncpa [#allocation6 + $0x1], 0  ;;  %s2160_s23 = smov 0   ;;  %s2162_s24 = smov 0  }
   0x7   :  { %s2164_s25 = smov 0   ;;  %s2166_s26 = smov 0  }
   0x8 LB: > { %s2181_s0 = sadd.s32 4294967295, %s2112_s26   ;;  %s1553_s27 = sadd.s32 4294967294, %s2112_s26   ;;  %s2112_s26 = sphi %s2166_s26, %s2849_s26   ;;  %s2108_s25 = sphi %s2164_s25, %s2848_s25   ;;  %s2104_s24 = sphi %s2162_s24, %s2847_s24   ;;  %s2100_s23 = sphi %s2160_s23, %s2846_s23  }
   0x9   : > { %p44_p0 = scmp.ne.s32.totalorder %s2104_s24, %s2100_s23  ;;  %p45_p1 = scmp.eq.s32.totalorder %s2181_s0, 0 }
   0xa   : > { %p152_p2 = scmp.eq.s32.totalorder %s2181_s0, 1  ;;  %p158_p3 = scmp.eq.s32.totalorder %s1553_s27, 1 }
   0xb   : > { %p2190_p4 = por %p45_p1, %p44_p0  ;;  %p1554_p5 = scmp.ge.s32.totalorder %s2112_s26, 1 }
   0xc   : > { %p2195_p6 = por %p158_p3, %p44_p0  ;;  %p165_p7 = scmp.lt.s32.totalorder %s2112_s26, 3 }
   0xd   : > { %s176_s8 = sshll.u32 %s2827_s2, 4  ;;  %s2114_s10 = smov [#allocation7]   ;;  %s177_s8 = int_to_ptr.hbm [resolvable:$true] %s176_s8 }
   0xe   : > { %p2203_p8 = pnand %p1554_p5, %p165_p7  ;;  %s178_s11 = sshll.u32 %s2114_s10, 4  ;;  %s179_s11 = int_to_ptr.vmem [resolvable:$true] %s178_s11 }
   0xf   : > { %s193_s14 = sshll.u32 %s2829_s4, 4  ;;  %s2832_s15 = smov 128   ;;  %s194_s14 = int_to_ptr.hbm [resolvable:$true] %s193_s14 }
  0x10   : > { %p1826_p9 = pneg %p2203_p8  ;;  %s2116_s16 = smov 8  }
  0x11   : > { %s2117_s17 = smov [#allocation9]   ;;  %s2118_s19 = smov 64  }
  0x12   : > { %p1827_p10 = pnand %p1826_p9, %p45_p1  ;;  %s195_s18 = sshll.u32 %s2117_s17, 4  ;;  %s196_s18 = int_to_ptr.vmem [resolvable:$true] %s195_s18 }
  0x13   : > { %s2119_s20 = smov 4   ;;  %s2219_s21 = sadd.s32 1, %s2112_s26  }
  0x14   : > { %1829 = dma.hbm_to_vmem [thread:$0]  (!%p1827_p10), %s177_s8, 2048, %s179_s11, [#allocation8], %s2832_s15, %s2832_s15, %s2116_s16  }
  0x15   : > { %1832 = dma.hbm_to_vmem [thread:$0]  (!%p1827_p10), %s194_s14, 2048, %s196_s18, [#allocation8], %s2118_s19, %s2118_s19, %s2119_s20  }
  0x16   : > { %s28_s22 = ssub.s32 %s2112_s26, %s2219_s21  ;;  %s31_s27 = sadd.s32 1, %s2108_s25 }
  0x17   : > { %p29_p12 = scmp.eq.s32.totalorder %s28_s22, 0  ;;  %p38_p13 = scmp.ne.s32.totalorder %s2108_s25, %s2104_s24 }
  0x18   : > { %p39_p0 = scmp.eq.s32.totalorder %s2112_s26, 0  ;;  %p1843_p7 = scmp.lt.s32.totalorder %s2112_s26, 2 }
  0x19   : > { %s2228_s30 = scalar_select %p29_p12, %s2108_s25, %s31_s27  }
  0x1a   : > { %p40_p3 = por %p39_p0, %p38_p13  ;;  %p2232_p5 = por %p152_p2, %p38_p13 }
  0x1b   : > { %s212_s8 = sand.u32 1, %s2108_s25   ;;  %s1780_s11 = sshll.u32 %s2112_s26, 7 }
  0x1c   : > { %s1558_s10 = sshll.u32 %s212_s8, 7  ;;  %s221_s14 = scalar_lea.hbm %s2826_s1, %s1780_s11 }
  0x1d   : > { %s216_s17 = scalar_lea.vmem [#allocation4], %s1558_s10  ;;  %s222_s19 = sshll.u32 %s221_s14, 4  ;;  %s223_s19 = int_to_ptr.hbm [resolvable:$true] %s222_s19 }
  0x1e   : > { %s224_s18 = sshll.u32 %s216_s17, 4  ;;  %p2242_p9 = pnand %p1843_p7, %p40_p3  ;;  %s225_s18 = int_to_ptr.vmem [resolvable:$true] %s224_s18 }
  0x1f   : > { %s213_s22 = scalar_lea.sflag [#allocation5], %s212_s8  ;;  %s2012_s27 = sshra.s32 %s223_s19, 4  ;;  %s2013_s27 = int_to_ptr.hbm [resolvable:$true] %s2012_s27 }
  0x20   : > { %s2014_s15 = scalar_lea.hbm %s2013_s27, 128  ;;  %p2016_p10 = pneg %p2242_p9 }
  0x21   : > { %p2015_p2 = scmp.ne.s32.totalorder %s2013_s27, %s2014_s15  ;;  %s2019_s12 = scalar_lea.hbm %s2826_s1, 256 }
  0x22   : > { %p2020_p0 = scmp.lt.s32.totalorder %s2013_s27, %s2826_s1  ;;  %p2021_p3 = scmp.lt.s32.totalorder %s2019_s12, %s2014_s15 }
  0x23   : > { %p2017_p12 = pnand %p2016_p10, %p2015_p2 }
  0x24   : > { %p2022_p7 = por %p2021_p3, %p2020_p0 }
  0x25   : > { %p2018_p13 = pneg %p2017_p12 }
  0x27   : > { %p2023_p11 = pnand %p2022_p7, %p2018_p13 }
  0x29   : > { %2026 = shalt.err (!%p2023_p11)
}
  0x2a   : > { %s2838_s8 = smov 128   ;;  %236 = sbr.rel (%p2203_p8) target bundleno = 523 (0x20b), region = 40 }
  0x2b   : > { %1836 = dma.hbm_to_vmem [thread:$0]  (!%p2242_p9), %s223_s19, 2048, %s225_s18, %s213_s22, %s2838_s8, %s2838_s8, %s2116_s16  }
  0x2c   : > { %s2262_s17 = sand.u32 (!%p2203_p8), 1, %s2104_s24  }
  0x2d   : > { %s1562_s15 = sshll.u32 (!%p2203_p8), %s2262_s17, 7  ;;  %s239_s27 = scalar_lea.sflag (!%p2203_p8), [#allocation5], %s2262_s17 }
  0x2e   : > { %s2268_s11 = scalar_lea.vmem (!%p2203_p8), [#allocation4], %s1562_s15 }
  0x2f   : > { %2087 = dma.done.wait (%p2190_p4), %s239_s27, 2048  }
  0x30   : > { %2089 = vsyncadd (%p2190_p4), %s239_s27, 4294965248 }
  0x31   : > { %2091 = dma.done.wait (%p45_p1), [#allocation8], 4096  }
  0x32   : > { %2093 = vsyncadd (%p45_p1), [#allocation8], 4294963200  ;;  %v1624_v0 = vld [vmem:[#allocation7 + $0x70] sm:$0xf]  ;;  %v1796_v1 = vld [vmem:[#allocation7 + $0x74] sm:$0xf0] }
  0x33   : > { %v1795_v2 = vld [vmem:[#allocation7 + $0x74] sm:$0xf]  ;;  %v1625_v3 = vor.u32 %v1796_v1, %v1624_v0  ;;  %v1626_v4 = vld [vmem:[#allocation7 + $0x78] sm:$0xf0]  ;;  %v1616_v5 = vld [vmem:[#allocation7 + $0x60] sm:$0xf] }
  0x34   : > { %v1794_v6 = vld [vmem:[#allocation7 + $0x64] sm:$0xf0]  ;;  %v1629_v7 = vor.u32 %v1795_v2, %v1626_v4  ;;  %v1793_v8 = vld [vmem:[#allocation7 + $0x64] sm:$0xf]  ;;  %v1618_v9 = vld [vmem:[#allocation7 + $0x68] sm:$0xf0] }
  0x35   : > { %408 = vmatpush.bf16.msra.mxu0 %v1625_v3  ;;  %v1617_v10 = vor.u32 %v1794_v6, %v1616_v5  ;;  %v1621_v11 = vor.u32 %v1793_v8, %v1618_v9  ;;  %v1608_v12 = vld [vmem:[#allocation7 + $0x50] sm:$0xf]  ;;  %v1792_v13 = vld [vmem:[#allocation7 + $0x54] sm:$0xf0]  ;;  %v1791_v14 = vld [vmem:[#allocation7 + $0x54] sm:$0xf] }
  0x36   : > { %457 = vmatpush.bf16.msra.mxu1 %v1629_v7  ;;  %v1610_v15 = vld [vmem:[#allocation7 + $0x58] sm:$0xf0]  ;;  %v1609_v16 = vor.u32 %v1792_v13, %v1608_v12  ;;  %v1600_v18 = vld [vmem:[#allocation7 + $0x40] sm:$0xf]  ;;  %v1790_v19 = vld [vmem:[#allocation7 + $0x44] sm:$0xf0]  ;;  %v796_v7 = vlaneseq }
  0x37   : > { %v1613_v17 = vor.u32 %v1791_v14, %v1610_v15  ;;  %v1789_v20 = vld [vmem:[#allocation7 + $0x44] sm:$0xf]  ;;  %v1602_v21 = vld [vmem:[#allocation7 + $0x48] sm:$0xf0]  ;;  %v1601_v22 = vor.u32 %v1790_v19, %v1600_v18  ;;  %v1592_v24 = vld [vmem:[#allocation7 + $0x30] sm:$0xf] }
  0x38   : > { %v1605_v23 = vor.u32 %v1789_v20, %v1602_v21  ;;  %v1788_v25 = vld [vmem:[#allocation7 + $0x34] sm:$0xf0]  ;;  %v1787_v26 = vld [vmem:[#allocation7 + $0x34] sm:$0xf]  ;;  %v1594_v27 = vld [vmem:[#allocation7 + $0x38] sm:$0xf0] }
  0x39   : > { %409 = vmatpush.bf16.msra.mxu0 %v1617_v10  ;;  %v1593_v28 = vor.u32 %v1788_v25, %v1592_v24  ;;  %v1597_v29 = vor.u32 %v1787_v26, %v1594_v27  ;;  %v1584_v30 = vld [vmem:[#allocation7 + $0x20] sm:$0xf]  ;;  %v1786_v31 = vld [vmem:[#allocation7 + $0x24] sm:$0xf0]  ;;  %v1785_v32 = vld [vmem:[#allocation7 + $0x24] sm:$0xf] }
  0x3a   : > { %458 = vmatpush.bf16.msra.mxu1 %v1621_v11  ;;  %v1586_v33 = vld [vmem:[#allocation7 + $0x28] sm:$0xf0]  ;;  %v1585_v34 = vor.u32 %v1786_v31, %v1584_v30  ;;  %v1576_v36 = vld [vmem:[#allocation7 + $0x10] sm:$0xf]  ;;  %v1784_v37 = vld [vmem:[#allocation7 + $0x14] sm:$0xf0] }
  0x3b   : > { %v1589_v35 = vor.u32 %v1785_v32, %v1586_v33  ;;  %v1783_v38 = vld [vmem:[#allocation7 + $0x14] sm:$0xf]  ;;  %v1578_v39 = vld [vmem:[#allocation7 + $0x18] sm:$0xf0]  ;;  %v1577_v40 = vor.u32 %v1784_v37, %v1576_v36  ;;  %v1568_v42 = vld [vmem:[#allocation7] sm:$0xf] }
  0x3c   : > { %v1581_v41 = vor.u32 %v1783_v38, %v1578_v39  ;;  %v1782_v43 = vld [vmem:[#allocation7 + $0x4] sm:$0xf0]  ;;  %v1781_v44 = vld [vmem:[#allocation7 + $0x4] sm:$0xf]  ;;  %v1570_v45 = vld [vmem:[#allocation7 + $0x8] sm:$0xf0] }
  0x3d   : > { %410 = vmatpush.bf16.msra.mxu0 %v1609_v16  ;;  %v1569_v46 = vor.u32 %v1782_v43, %v1568_v42  ;;  %v282_v47 = vld [vmem:[%s2268_s11] sm:$0xff]  ;;  %v283_v48 = vld [vmem:[%s2268_s11 + $0x8] sm:$0xff]  ;;  %v1573_v49 = vor.u32 %v1781_v44, %v1570_v45  ;;  %v284_v51 = vld [vmem:[%s2268_s11 + $0x10] sm:$0xff]  ;;  %s2292_s28 = sld [smem:[#allocation3]]  ;;  %s1630_s9 = sshll.u32 %s2181_s0, 7  ;;  %v2295_v10 = vshrl.u32 %v796_v7, 7 }
  0x3e   : > { %459 = vmatpush.bf16.msra.mxu1 %v1613_v17  ;;  %v298_v50 = vpack.c.bf16 %v283_v48, %v282_v47  ;;  %v285_v52 = vld [vmem:[%s2268_s11 + $0x18] sm:$0xff]  ;;  %v286_v54 = vld [vmem:[%s2268_s11 + $0x20] sm:$0xff]  ;;  %v287_v55 = vld [vmem:[%s2268_s11 + $0x28] sm:$0xff]  ;;  %v831_v14 = vand.u32 127, %v796_v7  ;;  %v2304_v17 = vstv %s1630_s9  ;;  %s2757_s12 = scalar_lea.vmem [#allocation10], %s1562_s15  ;;  %s1457_s8 = scalar_lea.hbm %s2831_s6, %s1630_s9 }
  0x3f   : > { %v299_v53 = vpack.c.bf16 %v285_v52, %v284_v51  ;;  %v300_v56 = vpack.c.bf16 %v287_v55, %v286_v54  ;;  %v288_v57 = vld [vmem:[%s2268_s11 + $0x30] sm:$0xff]  ;;  %v289_v58 = vld [vmem:[%s2268_s11 + $0x38] sm:$0xff]  ;;  %v290_v60 = vld [vmem:[%s2268_s11 + $0x40] sm:$0xff]  ;;  %v798_v13 = vadd.s32 8, %v2295_v10  ;;  %v814_v18 = vadd.s32 %v2304_v17, %v2295_v10  ;;  %s1460_s15 = sshll.u32 %s1457_s8, 4  ;;  %s1458_s27 = sshll.u32 %s2757_s12, 4  ;;  %s1461_s15 = int_to_ptr.hbm [resolvable:$true] %s1460_s15  ;;  %s1459_s27 = int_to_ptr.vmem [resolvable:$true] %s1458_s27 }
  0x40   : > { %v301_v59 = vpack.c.bf16 %v289_v58, %v288_v57  ;;  %v291_v61 = vld [vmem:[%s2268_s11 + $0x48] sm:$0xff]  ;;  %v292_v63 = vld [vmem:[%s2268_s11 + $0x50] sm:$0xff]  ;;  %v293_v0 = vld [vmem:[%s2268_s11 + $0x58] sm:$0xff]  ;;  %v832_v20 = vadd.s32 128, %v831_v14  ;;  %v800_v51 = vadd.s32 24, %v2295_v10 }
  0x41   : > { %411 = vmatpush.bf16.msra.mxu0 %v1601_v22  ;;  %v302_v62 = vpack.c.bf16 %v291_v61, %v290_v60  ;;  %v303_v1 = vpack.c.bf16 %v293_v0, %v292_v63  ;;  %v294_v2 = vld [vmem:[%s2268_s11 + $0x60] sm:$0xff]  ;;  %v295_v3 = vld [vmem:[%s2268_s11 + $0x68] sm:$0xff]  ;;  %v1804_v5 = vld [vmem:[#allocation9 + $0x38] sm:$0xff]  ;;  %v815_v19 = vadd.s32 %v2304_v17, %v798_v13 }
  0x42   : > { %460 = vmatpush.bf16.msra.mxu1 %v1605_v23  ;;  %v304_v4 = vpack.c.bf16 %v295_v3, %v294_v2  ;;  %v1812_v6 = vld [vmem:[#allocation9 + $0x78] sm:$0xff]  ;;  %1331 = vmatpush.bf16.msra.mxu2 %v1804_v5  ;;  %v1803_v8 = vld [vmem:[#allocation9 + $0x30] sm:$0xff]  ;;  %v1802_v15 = vld [vmem:[#allocation9 + $0x28] sm:$0xff]  ;;  %v817_v57 = vadd.s32 %v2304_v17, %v800_v51 }
  0x43   : > { %1380 = vmatpush.bf16.msra.mxu3 %v1812_v6  ;;  %v1811_v9 = vld [vmem:[#allocation9 + $0x70] sm:$0xff]  ;;  %s833_s16 = smul.u32 3266489917, %s2292_s28  ;;  %v297_v12 = vld [vmem:[%s2268_s11 + $0x78] sm:$0xff]  ;;  %v1810_v16 = vld [vmem:[#allocation9 + $0x68] sm:$0xff] }
  0x44   : > { %s915_s18 = smul.u32 668265263, %s2292_s28  ;;  %v296_v11 = vld [vmem:[%s2268_s11 + $0x70] sm:$0xff]  ;;  %v1800_v37 = vld [vmem:[#allocation9 + $0x18] sm:$0xff]  ;;  %v1798_v52 = vld [vmem:[#allocation9 + $0x8] sm:$0xff]  ;;  %s1446_s11 = scalar_lea.sflag [#allocation6], %s2262_s17 }
  0x45   : > { %412 = vmatpush.bf16.msra.mxu0 %v1593_v28  ;;  %v305_v21 = vpack.c.bf16 %v297_v12, %v296_v11  ;;  %v2309_v22 = vstv %s833_s16  ;;  %v1801_v28 = vld [vmem:[#allocation9 + $0x20] sm:$0xff]  ;;  %v1808_v38 = vld [vmem:[#allocation9 + $0x58] sm:$0xff]  ;;  %v1799_v43 = vld [vmem:[#allocation9 + $0x10] sm:$0xff]  ;;  %s2056_s28 = sshra.s32 %s1461_s15, 4  ;;  %s2057_s28 = int_to_ptr.hbm [resolvable:$true] %s2056_s28 }
  0x46   : > { %461 = vmatpush.bf16.msra.mxu1 %v1597_v29  ;;  %1332 = vmatpush.bf16.msra.mxu2 %v1803_v8  ;;  %v916_v23 = vstv %s915_s18  ;;  %v835_v24 = vadd.s32 %v2309_v22, %v814_v18  ;;  %v836_v25 = vadd.s32 %v2309_v22, %v815_v19  ;;  %v1809_v29 = vld [vmem:[#allocation9 + $0x60] sm:$0xff]  ;;  %v1807_v44 = vld [vmem:[#allocation9 + $0x50] sm:$0xff]  ;;  %s2058_s0 = scalar_lea.hbm %s2057_s28, 128  ;;  %s2062_s18 = scalar_lea.hbm %s2831_s6, 256 }
  0x47   : > { %1381 = vmatpush.bf16.msra.mxu3 %v1811_v9  ;;  %v917_v26 = vxor.u32 %v916_v23, %v831_v14  ;;  %v918_v27 = vxor.u32 %v916_v23, %v832_v20  ;;  %v1797_v0 = vld [vmem:[#allocation9] sm:$0xff]  ;;  %p2059_p1 = scmp.ne.s32.totalorder %s2057_s28, %s2058_s0  ;;  %p2063_p11 = scmp.lt.s32.totalorder %s2057_s28, %s2831_s6 }
  0x48   : > { %v851_v30 = vmul.u32 2654435761, %v835_v24  ;;  %v852_v31 = vmul.u32 2654435761, %v836_v25  ;;  %p2064_p9 = scmp.lt.s32.totalorder %s2062_s18, %s2058_s0 }
  0x49   : > { %413 = vmatpush.bf16.msra.mxu0 %v1585_v34  ;;  %v919_v32 = vmul.u32 2246822519, %v917_v26  ;;  %v920_v33 = vmul.u32 2246822519, %v918_v27  ;;  %p2060_p4 = pnand %p2059_p1, %p2232_p5 }
  0x4a   : > { %462 = vmatpush.bf16.msra.mxu1 %v1589_v35  ;;  %1333 = vmatpush.bf16.msra.mxu2 %v1802_v15  ;;  %v867_v34 = vshrl.u32 %v851_v30, 16  ;;  %v868_v35 = vshrl.u32 %v852_v31, 16  ;;  %p2065_p2 = por %p2064_p9, %p2063_p11 }
  0x4b   : > { %1382 = vmatpush.bf16.msra.mxu3 %v1810_v16  ;;  %v921_v36 = vshrl.u32 %v919_v32, 16  ;;  %v922_v39 = vshrl.u32 %v920_v33, 16  ;;  %p2061_p8 = pneg %p2060_p4 }
  0x4d   : > { %414 = vmatpush.bf16.msra.mxu0 %v1577_v40  ;;  %v883_v40 = vxor.u32 %v867_v34, %v851_v30  ;;  %v923_v42 = vxor.u32 %v921_v36, %v919_v32  ;;  %v924_v45 = vxor.u32 %v922_v39, %v920_v33  ;;  %p2066_p10 = pnand %p2065_p2, %p2061_p8 }
  0x4e   : > { %463 = vmatpush.bf16.msra.mxu1 %v1581_v41  ;;  %1334 = vmatpush.bf16.msra.mxu2 %v1801_v28  ;;  %v884_v41 = vxor.u32 %v868_v35, %v852_v31 }
  0x4f   : > { %1383 = vmatpush.bf16.msra.mxu3 %v1809_v29  ;;  %v899_v47 = vmul.u32 2146121005, %v883_v40  ;;  %v2320_v54 = vmul.u32 2221713035, %v924_v45 }
  0x50   : > { %v900_v48 = vmul.u32 2146121005, %v884_v41 }
  0x51   : > { %415 = vmatpush.bf16.msra.mxu0 %v1569_v46  ;;  %v322_v46 = vld [vmem:[%s2828_s3] sm:$0x3]  ;;  %v928_v2 = vxor.u32 %v2320_v54, %v899_v47 }
  0x52   : > { %464 = vmatpush.bf16.msra.mxu1 %v1573_v49  ;;  %1335 = vmatpush.bf16.msra.mxu2 %v1800_v37  ;;  %v2316_v49 = vmul.u32 2221713035, %v923_v42  ;;  %v2322_v55 = vperm.slane %v322_v46, 0  ;;  %v2326_v58 = vperm.slane %v322_v46, 1  ;;  %v930_v3 = vxor.u32 %v2320_v54, %v900_v48 }
  0x53   : > { %1384 = vmatpush.bf16.msra.mxu3 %v1808_v38  ;;  %v960_v15 = vshrl.u32 %v928_v2, 15 }
  0x54   : > { %416 = vmatmul.bf16.vlgmr.msra.gmra.mxu0 %v298_v50  ;;  %v929_v60 = vxor.u32 %v2316_v49, %v900_v48  ;;  %v962_v16 = vshrl.u32 %v930_v3, 15 }
  0x55   : > { %465 = vmatmul.bf16.vlgmr.msra.gmra.mxu1 %v298_v50  ;;  %v799_v50 = vadd.s32 16, %v2295_v10  ;;  %v992_v30 = vxor.u32 %v960_v15, %v928_v2 }
  0x56   : > { %1336 = vmatpush.bf16.msra.mxu2 %v1799_v43  ;;  %v961_v12 = vshrl.u32 %v929_v60, 15  ;;  %v994_v31 = vxor.u32 %v962_v16, %v930_v3 }
  0x57   : > { %1385 = vmatpush.bf16.msra.mxu3 %v1807_v44 }
  0x58   : > { %v993_v26 = vxor.u32 %v961_v12, %v929_v60 }
  0x5a   : > { %1337 = vmatpush.bf16.msra.mxu2 %v1798_v52  ;;  %v1025_v52 = vmul.u32 739982445, %v993_v26 }
  0x5e   : > { %1338 = vmatpush.bf16.msra.mxu2 %v1797_v0 }
  0x64   : > { %421 = vmatmul.bf16.gmra.mxu0 %v299_v53 }
  0x65   : > { %470 = vmatmul.bf16.gmra.mxu1 %v299_v53  ;;  %v1806_v53 = vld [vmem:[#allocation9 + $0x48] sm:$0xff] }
  0x66   : > { %1386 = vmatpush.bf16.msra.mxu3 %v1806_v53 }
  0x74   : > { %426 = vmatmul.bf16.gmra.mxu0 %v300_v56 }
  0x75   : > { %475 = vmatmul.bf16.gmra.mxu1 %v300_v56  ;;  %v816_v56 = vadd.s32 %v2304_v17, %v799_v50 }
  0x77   : > { %v837_v61 = vadd.s32 %v2309_v22, %v816_v56 }
  0x79   : > { %v853_v6 = vmul.u32 2654435761, %v837_v61 }
  0x7b   : > { %v869_v13 = vshrl.u32 %v853_v6, 16 }
  0x7d   : > { %v885_v20 = vxor.u32 %v869_v13, %v853_v6 }
  0x7f   : > { %v901_v27 = vmul.u32 2146121005, %v885_v20 }
  0x81   : > { %v931_v36 = vxor.u32 %v2316_v49, %v901_v27  ;;  %v932_v37 = vxor.u32 %v2320_v54, %v901_v27 }
  0x83   : > { %v963_v44 = vshrl.u32 %v931_v36, 15  ;;  %v964_v45 = vshrl.u32 %v932_v37, 15 }
  0x84   : > { %431 = vmatmul.bf16.gmra.mxu0 %v301_v59 }
  0x85   : > { %480 = vmatmul.bf16.gmra.mxu1 %v301_v59  ;;  %v927_v59 = vxor.u32 %v2316_v49, %v899_v47  ;;  %v995_v61 = vxor.u32 %v963_v44, %v931_v36  ;;  %v802_v36 = vadd.s32 40, %v2295_v10 }
  0x87   : > { %v959_v11 = vshrl.u32 %v927_v59, 15 }
  0x89   : > { %v991_v25 = vxor.u32 %v959_v11, %v927_v59  ;;  %v1026_v59 = vmul.u32 739982445, %v994_v31  ;;  %v801_v31 = vadd.s32 32, %v2295_v10 }
  0x8b   : > { %v1023_v48 = vmul.u32 739982445, %v991_v25 }
  0x94   : > { %436 = vmatmul.bf16.gmra.mxu0 %v302_v62 }
  0x95   : > { %485 = vmatmul.bf16.gmra.mxu1 %v302_v62  ;;  %v838_v62 = vadd.s32 %v2309_v22, %v817_v57  ;;  %v1024_v57 = vmul.u32 739982445, %v992_v30 }
  0x97   : > { %v854_v8 = vmul.u32 2654435761, %v838_v62  ;;  %v996_v62 = vxor.u32 %v964_v45, %v932_v37  ;;  %v2376_v13 = vxor.u32 2147483648, %v1024_v57 }
  0x99   : > { %v870_v18 = vshrl.u32 %v854_v8, 16  ;;  %v1028_v20 = vmul.u32 739982445, %v996_v62  ;;  %vm1060_vm2 = vcmp.lt.s32.totalorder %v2376_v13, 1717986918 }
  0x9b   : > { %v886_v23 = vxor.u32 %v870_v18, %v854_v8  ;;  %v2370_v8 = vxor.u32 2147483648, %v1025_v52 }
  0x9d   : > { %v902_v32 = vmul.u32 2146121005, %v886_v23  ;;  %vm1063_vm1 = vcmp.lt.s32.totalorder %v2370_v8, 1717986918 }
  0x9f   : > { %v933_v40 = vxor.u32 %v2316_v49, %v902_v32  ;;  %v934_v41 = vxor.u32 %v2320_v54, %v902_v32 }
  0xa1   : > { %v965_v50 = vshrl.u32 %v933_v40, 15  ;;  %v966_v53 = vshrl.u32 %v934_v41, 15 }
  0xa3   : > { %v997_v2 = vxor.u32 %v965_v50, %v933_v40 }
  0xa4   : > { %441 = vmatmul.bf16.gmra.mxu0 %v303_v1 }
  0xa5   : > { %490 = vmatmul.bf16.gmra.mxu1 %v303_v1  ;;  %v1805_v1 = vld [vmem:[#allocation9 + $0x40] sm:$0xff]  ;;  %v1029_v26 = vmul.u32 739982445, %v997_v2 }
  0xa6   : > { %1387 = vmatpush.bf16.msra.mxu3 %v1805_v1  ;;  %v2364_v1 = vxor.u32 2147483648, %v1023_v48 }
  0xa7   : > { %v2394_v40 = vxor.u32 2147483648, %v1029_v26  ;;  %v803_v26 = vadd.s32 48, %v2295_v10 }
  0xa8   : > { %vm1057_vm0 = vcmp.lt.s32.totalorder %v2364_v1, 1717986918 }
  0xa9   : > { %vm2430_vm4 = vmpackc.low %vm1063_vm1, %vm1057_vm0  ;;  %vm1075_vm7 = vcmp.lt.s32.totalorder %v2394_v40, 1717986918 }
  0xb4   : > { %446 = vmatmul.bf16.gmra.mxu0 %v304_v4 }
  0xb5   : > { %495 = vmatmul.bf16.gmra.mxu1 %v304_v4 }
  0xc4   : > { %451 = vmatmul.bf16.gmra.mxu0 %v305_v21 }
  0xc5   : > { %500 = vmatmul.bf16.gmra.mxu1 %v305_v21 }
  0xd1   : > { %v417_v63 = vpop.f32.mrf.mxu0 }
  0xd2   : > { %v2335_v4 = vadd.f32 %v417_v63, %v2322_v55  ;;  %v466_v5 = vpop.f32.mrf.mxu1 }
  0xd3   : > { %v2338_v7 = vadd.f32 %v466_v5, %v2326_v58 }
  0xd4   : > { %v506_v9 = vmul.f32 %v2335_v4, %v2335_v4 }
  0xd5   : > { %v507_v14 = vmul.f32 %v2338_v7, %v2338_v7 }
  0xd6   : > { %v538_v19 = vmul.f32 %v506_v9, %v2335_v4  ;;  %v998_v9 = vxor.u32 %v966_v53, %v934_v41  ;;  %v2396_v41 = vxor.u32 2147483648, %v1028_v20 }
  0xd7   : > { %v539_v21 = vmul.f32 %v507_v14, %v2338_v7  ;;  %v2378_v14 = vxor.u32 2147483648, %v1026_v59 }
  0xd8   : > { %v570_v24 = vmul.f32 0.044715, %v538_v19  ;;  %v1027_v19 = vmul.u32 739982445, %v995_v61  ;;  %vm1072_vm8 = vcmp.lt.s32.totalorder %v2396_v41, 1717986918 }
  0xd9   : > { %v571_v28 = vmul.f32 0.044715, %v539_v21  ;;  %v419_v29 = vpop.f32.mrf.mxu0  ;;  %vm1066_vm3 = vcmp.lt.s32.totalorder %v2378_v14, 1717986918 }
  0xda   : > { %v602_v33 = vadd.f32 %v570_v24, %v2335_v4  ;;  %v2348_v34 = vadd.f32 %v419_v29, %v2322_v55  ;;  %v468_v35 = vpop.f32.mrf.mxu1  ;;  %vm1751_vm5 = vmpackc.low %vm1066_vm3, %vm1060_vm2 }
  0xdb   : > { %v603_v38 = vadd.f32 %v571_v28, %v2338_v7  ;;  %v2354_v39 = vadd.f32 %v468_v35, %v2326_v58  ;;  %v1030_v28 = vmul.u32 739982445, %v998_v9  ;;  %v2391_v35 = vxor.u32 2147483648, %v1027_v19 }
  0xdc   : > { %v634_v42 = vmul.f32 0.7978846, %v602_v33  ;;  %v508_v43 = vmul.f32 %v2348_v34, %v2348_v34 }
  0xdd   : > { %v635_v46 = vmul.f32 0.7978846, %v603_v38  ;;  %v509_v47 = vmul.f32 %v2354_v39, %v2354_v39  ;;  %vm1069_vm6 = vcmp.lt.s32.totalorder %v2391_v35, 1717986918 }
  0xde   : > { %1888 = vtanh.f32 %v634_v42  ;;  %v540_v51 = vmul.f32 %v508_v43, %v2348_v34  ;;  %v818_v42 = vadd.s32 %v2304_v17, %v801_v31  ;;  %vm2493_vm10 = vmpackc.low %vm1075_vm7, %vm1069_vm6 }
  0xdf   : > { %1890 = vtanh.f32 %v635_v46  ;;  %v541_v56 = vmul.f32 %v509_v47, %v2354_v39  ;;  %v2403_v46 = vxor.u32 2147483648, %v1030_v28  ;;  %v819_v47 = vadd.s32 %v2304_v17, %v802_v36 }
  0xe0   : > { %v572_v60 = vmul.f32 0.044715, %v540_v51  ;;  %v839_v52 = vadd.s32 %v2309_v22, %v818_v42 }
  0xe1   : > { %v573_v63 = vmul.f32 0.044715, %v541_v56  ;;  %v422_v0 = vpop.f32.mrf.mxu0  ;;  %vm1078_vm9 = vcmp.lt.s32.totalorder %v2403_v46, 1717986918 }
  0xe2   : > { %v604_v3 = vadd.f32 %v572_v60, %v2348_v34  ;;  %v2368_v5 = vadd.f32 %v422_v0, %v2322_v55  ;;  %v471_v6 = vpop.f32.mrf.mxu1  ;;  %v840_v60 = vadd.s32 %v2309_v22, %v819_v47  ;;  %v855_v2 = vmul.u32 2654435761, %v839_v52  ;;  %vm1754_vm11 = vmpackc.low %vm1078_vm9, %vm1072_vm8 }
  0xe3   : > { %v605_v11 = vadd.f32 %v573_v63, %v2354_v39  ;;  %v2374_v12 = vadd.f32 %v471_v6, %v2326_v58 }
  0xe4   : > { %v1889_v15 = vpop.eup %1888  ;;  %v636_v16 = vmul.f32 0.7978846, %v604_v3  ;;  %v510_v18 = vmul.f32 %v2368_v5, %v2368_v5  ;;  %v856_v9 = vmul.u32 2654435761, %v840_v60 }
  0xe5   : > { %v1891_v21 = vpop.eup %1890  ;;  %v637_v23 = vmul.f32 0.7978846, %v605_v11  ;;  %v511_v24 = vmul.f32 %v2374_v12, %v2374_v12  ;;  %v698_v25 = vadd.f32 1.0, %v1889_v15 }
  0xe6   : > { %1892 = vtanh.f32 %v636_v16  ;;  %v542_v27 = vmul.f32 %v510_v18, %v2368_v5  ;;  %v699_v30 = vadd.f32 1.0, %v1891_v21  ;;  %v871_v16 = vshrl.u32 %v855_v2, 16 }
  0xe7   : > { %1894 = vtanh.f32 %v637_v23  ;;  %v543_v29 = vmul.f32 %v511_v24, %v2374_v12  ;;  %v730_v33 = vmul.f32 0.5, %v698_v25  ;;  %v872_v20 = vshrl.u32 %v856_v9, 16 }
  0xe8   : > { %v574_v32 = vmul.f32 0.044715, %v542_v27  ;;  %v731_v51 = vmul.f32 0.5, %v699_v30  ;;  %v887_v25 = vxor.u32 %v871_v16, %v855_v2 }
  0xe9   : > { %v575_v37 = vmul.f32 0.044715, %v543_v29  ;;  %v424_v38 = vpop.f32.mrf.mxu0  ;;  %v762_v59 = vmul.f32 %v730_v33, %v2335_v4 }
  0xea   : > { %v606_v43 = vadd.f32 %v574_v32, %v2368_v5  ;;  %v2401_v44 = vadd.f32 %v424_v38, %v2322_v55  ;;  %v473_v45 = vpop.f32.mrf.mxu1  ;;  %v763_v19 = vmul.f32 %v731_v51, %v2338_v7  ;;  %v903_v1 = vmul.u32 2146121005, %v887_v25 }
  0xeb   : > { %v607_v48 = vadd.f32 %v575_v37, %v2374_v12  ;;  %v2408_v50 = vadd.f32 %v473_v45, %v2326_v58 }
  0xec   : > { %v1893_v53 = vpop.eup %1892  ;;  %v638_v56 = vmul.f32 0.7978846, %v606_v43  ;;  %v512_v57 = vmul.f32 %v2401_v44, %v2401_v44  ;;  %v935_v14 = vxor.u32 %v2316_v49, %v903_v1  ;;  %v936_v60 = vxor.u32 %v2320_v54, %v903_v1 }
  0xed   : > { %v1895_v61 = vpop.eup %1894  ;;  %v639_v62 = vmul.f32 0.7978846, %v607_v48  ;;  %v513_v63 = vmul.f32 %v2408_v50, %v2408_v50  ;;  %v700_v0 = vadd.f32 1.0, %v1893_v53 }
  0xee   : > { %1896 = vtanh.f32 %v638_v56  ;;  %v544_v3 = vmul.f32 %v512_v57, %v2401_v44  ;;  %v701_v6 = vadd.f32 1.0, %v1895_v61  ;;  %v967_v56 = vshrl.u32 %v935_v14, 15 }
  0xef   : > { %1898 = vtanh.f32 %v639_v62  ;;  %v545_v11 = vmul.f32 %v513_v63, %v2408_v50  ;;  %v732_v15 = vmul.f32 0.5, %v700_v0  ;;  %v804_v61 = vadd.s32 56, %v2295_v10 }
  0xf0   : > { %v576_v4 = vmul.f32 0.044715, %v544_v3  ;;  %v733_v18 = vmul.f32 0.5, %v701_v6  ;;  %v999_v0 = vxor.u32 %v967_v56, %v935_v14  ;;  %v2461_v3 = vadd.s32 %v2304_v17, %v803_v26 }
  0xf1   : > { %v577_v21 = vmul.f32 0.044715, %v545_v11  ;;  %v427_v23 = vpop.f32.mrf.mxu0  ;;  %v764_v24 = vmul.f32 %v732_v15, %v2348_v34  ;;  %v888_v34 = vxor.u32 %v872_v20, %v856_v9  ;;  %v968_v26 = vshrl.u32 %v936_v60, 15 }
  0xf2   : > { %v608_v27 = vadd.f32 %v576_v4, %v2401_v44  ;;  %v2424_v28 = vadd.f32 %v427_v23, %v2322_v55  ;;  %v476_v29 = vpop.f32.mrf.mxu1  ;;  %v765_v30 = vmul.f32 %v733_v18, %v2354_v39  ;;  %v1031_v20 = vmul.u32 739982445, %v999_v0 }
  0xf3   : > { %v609_v31 = vadd.f32 %v577_v21, %v2408_v50  ;;  %v2437_v32 = vadd.f32 %v476_v29, %v2326_v58  ;;  %v1728_v33 = vpack.c.bf16 %v764_v24, %v762_v59  ;;  %v904_v39 = vmul.u32 2146121005, %v888_v34 }
  0xf4   : > { %v1897_v8 = vpop.eup %1896  ;;  %v640_v36 = vmul.f32 0.7978846, %v608_v27  ;;  %v514_v37 = vmul.f32 %v2424_v28, %v2424_v28  ;;  %v1752_v38 = vpack.c.bf16 %v765_v30, %v763_v19 }
  0xf5   : > { %v1899_v42 = vpop.eup %1898  ;;  %v641_v43 = vmul.f32 0.7978846, %v609_v31  ;;  %v515_v45 = vmul.f32 %v2437_v32, %v2437_v32  ;;  %1729 = vmatmul.msk.bf16.vlgmr.msra.gmra.mxu2 %vm2430_vm4, %v1728_v33  ;;  %v702_v13 = vadd.f32 1.0, %v1897_v8  ;;  %v937_v51 = vxor.u32 %v2316_v49, %v904_v39 }
  0xf6   : > { %1900 = vtanh.f32 %v640_v36  ;;  %v546_v47 = vmul.f32 %v514_v37, %v2424_v28  ;;  %1753 = vmatmul.msk.bf16.vlgmr.msra.gmra.mxu3 %vm1751_vm5, %v1752_v38  ;;  %v703_v48 = vadd.f32 1.0, %v1899_v42  ;;  %v938_v2 = vxor.u32 %v2320_v54, %v904_v39 }
  0xf7   : > { %1902 = vtanh.f32 %v641_v43  ;;  %v547_v52 = vmul.f32 %v515_v45, %v2437_v32  ;;  %v734_v53 = vmul.f32 0.5, %v702_v13  ;;  %v969_v59 = vshrl.u32 %v937_v51, 15 }
  0xf8   : > { %v578_v57 = vmul.f32 0.044715, %v546_v47  ;;  %v735_v15 = vmul.f32 0.5, %v703_v48  ;;  %v970_v34 = vshrl.u32 %v938_v2, 15  ;;  %v2479_v36 = vxor.u32 2147483648, %v1031_v20 }
  0xf9   : > { %v579_v62 = vmul.f32 0.044715, %v547_v52  ;;  %v429_v63 = vpop.f32.mrf.mxu0  ;;  %v1001_v16 = vxor.u32 %v969_v59, %v937_v51  ;;  %v766_v19 = vmul.f32 %v734_v53, %v2368_v5  ;;  %v1000_v42 = vxor.u32 %v968_v26, %v936_v60 }
  0xfa   : > { %v610_v6 = vadd.f32 %v578_v57, %v2424_v28  ;;  %v2465_v9 = vadd.f32 %v429_v63, %v2322_v55  ;;  %v478_v11 = vpop.f32.mrf.mxu1  ;;  %v767_v5 = vmul.f32 %v735_v15, %v2374_v12  ;;  %v1002_v14 = vxor.u32 %v970_v34, %v938_v2 }
  0xfb   : > { %v611_v4 = vadd.f32 %v579_v62, %v2437_v32  ;;  %v2469_v18 = vadd.f32 %v478_v11, %v2326_v58  ;;  %v1033_v25 = vmul.u32 739982445, %v1001_v16  ;;  %v821_v47 = vadd.s32 %v2304_v17, %v804_v61 }
  0xfc   : > { %v1901_v21 = vpop.eup %1900  ;;  %v642_v23 = vmul.f32 0.7978846, %v610_v6  ;;  %v516_v24 = vmul.f32 %v2465_v9, %v2465_v9  ;;  %v1034_v35 = vmul.u32 739982445, %v1002_v14  ;;  %vm1081_vm12 = vcmp.lt.s32.totalorder %v2479_v36, 1717986918 }
  0xfd   : > { %v1903_v27 = vpop.eup %1902  ;;  %v643_v29 = vmul.f32 0.7978846, %v611_v4  ;;  %v517_v7 = vmul.f32 %v2469_v18, %v2469_v18  ;;  %v704_v30 = vadd.f32 1.0, %v1901_v21  ;;  %v2481_v39 = vxor.u32 2147483648, %v1033_v25 }
  0xfe   : > { %1904 = vtanh.f32 %v642_v23  ;;  %v548_v31 = vmul.f32 %v516_v24, %v2465_v9  ;;  %v705_v33 = vadd.f32 1.0, %v1903_v27  ;;  %v2514_v46 = vxor.u32 2147483648, %v1034_v35 }
  0xff   : > { %1906 = vtanh.f32 %v643_v29  ;;  %v549_v1 = vmul.f32 %v517_v7, %v2469_v18  ;;  %v736_v8 = vmul.f32 0.5, %v704_v30  ;;  %vm1087_vm13 = vcmp.lt.s32.totalorder %v2481_v39, 1717986918 }
 0x100   : > { %v580_v37 = vmul.f32 0.044715, %v548_v31  ;;  %v737_v38 = vmul.f32 0.5, %v705_v33  ;;  %v841_v20 = vadd.s32 %v2309_v22, %v2461_v3  ;;  %v842_v21 = vadd.s32 %v2309_v22, %v821_v47  ;;  %vm2557_vm0 = vmpackc.low %vm1087_vm13, %vm1081_vm12 }
 0x101   : > { %v581_v43 = vmul.f32 0.044715, %v549_v1  ;;  %v432_v45 = vpop.f32.mrf.mxu0  ;;  %v768_v13 = vmul.f32 %v736_v8, %v2401_v44  ;;  %v1032_v44 = vmul.u32 739982445, %v1000_v42  ;;  %vm1090_vm15 = vcmp.lt.s32.totalorder %v2514_v46, 1717986918 }
 0x102   : > { %v612_v12 = vadd.f32 %v580_v37, %v2465_v9  ;;  %v2487_v48 = vadd.f32 %v432_v45, %v2322_v55  ;;  %v481_v51 = vpop.f32.mrf.mxu1  ;;  %v769_v53 = vmul.f32 %v737_v38, %v2408_v50  ;;  %v805_v26 = vadd.s32 64, %v2295_v10 }
 0x103   : > { %v613_v56 = vadd.f32 %v581_v43, %v2469_v18  ;;  %v2500_v57 = vadd.f32 %v481_v51, %v2326_v58  ;;  %v1731_v59 = vpack.c.bf16 %v768_v13, %v766_v19  ;;  %v2508_v50 = vxor.u32 2147483648, %v1032_v44 }
 0x104   : > { %v1905_v40 = vpop.eup %1904  ;;  %v644_v60 = vmul.f32 0.7978846, %v612_v12  ;;  %v518_v61 = vmul.f32 %v2487_v48, %v2487_v48  ;;  %v1755_v62 = vpack.c.bf16 %v769_v53, %v767_v5  ;;  %v857_v30 = vmul.u32 2654435761, %v841_v20 }
 0x105   : > { %v1907_v63 = vpop.eup %1906  ;;  %v645_v0 = vmul.f32 0.7978846, %v613_v56  ;;  %v519_v2 = vmul.f32 %v2500_v57, %v2500_v57  ;;  %1732 = vmatmul.msk.bf16.gmra.mxu2 %vm2493_vm10, %v1731_v59  ;;  %v706_v41 = vadd.f32 1.0, %v1905_v40  ;;  %vm1084_vm14 = vcmp.lt.s32.totalorder %v2508_v50, 1717986918 }
 0x106   : > { %1908 = vtanh.f32 %v644_v60  ;;  %v550_v6 = vmul.f32 %v518_v61, %v2487_v48  ;;  %1756 = vmatmul.msk.bf16.gmra.mxu3 %vm1754_vm11, %v1755_v62  ;;  %v707_v11 = vadd.f32 1.0, %v1907_v63  ;;  %v806_v34 = vadd.s32 72, %v2295_v10  ;;  %vm1757_vm1 = vmpackc.low %vm1090_vm15, %vm1084_vm14 }
 0x107   : > { %1910 = vtanh.f32 %v645_v0  ;;  %v551_v15 = vmul.f32 %v519_v2, %v2500_v57  ;;  %v738_v16 = vmul.f32 0.5, %v706_v41  ;;  %v858_v33 = vmul.u32 2654435761, %v842_v21 }
 0x108   : > { %v582_v4 = vmul.f32 0.044715, %v550_v6  ;;  %v739_v19 = vmul.f32 0.5, %v707_v11  ;;  %v873_v37 = vshrl.u32 %v857_v30, 16  ;;  %v822_v38 = vadd.s32 %v2304_v17, %v805_v26 }
 0x109   : > { %v583_v23 = vmul.f32 0.044715, %v551_v15  ;;  %v434_v24 = vpop.f32.mrf.mxu0  ;;  %v770_v25 = vmul.f32 %v738_v16, %v2424_v28  ;;  %v874_v14 = vshrl.u32 %v858_v33, 16  ;;  %v823_v35 = vadd.s32 %v2304_v17, %v806_v34 }
 0x10a   : > { %v614_v27 = vadd.f32 %v582_v4, %v2487_v48  ;;  %v2529_v29 = vadd.f32 %v434_v24, %v2322_v55  ;;  %v483_v7 = vpop.f32.mrf.mxu1  ;;  %v771_v28 = vmul.f32 %v739_v19, %v2437_v32  ;;  %v889_v12 = vxor.u32 %v873_v37, %v857_v30 }
 0x10b   : > { %v615_v3 = vadd.f32 %v583_v23, %v2500_v57  ;;  %v2534_v31 = vadd.f32 %v483_v7, %v2326_v58  ;;  %v890_v53 = vxor.u32 %v874_v14, %v858_v33  ;;  %v2547_v63 = vadd.s32 %v2309_v22, %v822_v38 }
 0x10c   : > { %v1909_v5 = vpop.eup %1908  ;;  %v646_v1 = vmul.f32 0.7978846, %v614_v27  ;;  %v520_v8 = vmul.f32 %v2529_v29, %v2529_v29  ;;  %v905_v59 = vmul.u32 2146121005, %v889_v12 }
 0x10d   : > { %v1911_v42 = vpop.eup %1910  ;;  %v647_v43 = vmul.f32 0.7978846, %v615_v3  ;;  %v521_v45 = vmul.f32 %v2534_v31, %v2534_v31  ;;  %v708_v13 = vadd.f32 1.0, %v1909_v5  ;;  %v906_v62 = vmul.u32 2146121005, %v890_v53 }
 0x10e   : > { %1912 = vtanh.f32 %v646_v1  ;;  %v552_v47 = vmul.f32 %v520_v8, %v2529_v29  ;;  %v709_v32 = vadd.f32 1.0, %v1911_v42  ;;  %v939_v11 = vxor.u32 %v2316_v49, %v905_v59 }
 0x10f   : > { %1914 = vtanh.f32 %v647_v43  ;;  %v553_v51 = vmul.f32 %v521_v45, %v2534_v31  ;;  %v740_v52 = vmul.f32 0.5, %v708_v13  ;;  %v941_v36 = vxor.u32 %v2316_v49, %v906_v62 }
 0x110   : > { %v584_v44 = vmul.f32 0.044715, %v552_v47  ;;  %v741_v56 = vmul.f32 0.5, %v709_v32  ;;  %v971_v21 = vshrl.u32 %v939_v11, 15  ;;  %v940_v5 = vxor.u32 %v2320_v54, %v905_v59 }
 0x111   : > { %v585_v40 = vmul.f32 0.044715, %v553_v51  ;;  %v437_v60 = vpop.f32.mrf.mxu0  ;;  %v772_v61 = vmul.f32 %v740_v52, %v2465_v9  ;;  %v973_v46 = vshrl.u32 %v941_v36, 15  ;;  %v2582_v1 = vadd.s32 %v2309_v22, %v823_v35 }
 0x112   : > { %v616_v0 = vadd.f32 %v584_v44, %v2529_v29  ;;  %v2551_v2 = vadd.f32 %v437_v60, %v2322_v55  ;;  %v486_v41 = vpop.f32.mrf.mxu1  ;;  %v773_v9 = vmul.f32 %v741_v56, %v2469_v18  ;;  %v1003_v27 = vxor.u32 %v971_v21, %v939_v11 }
 0x113   : > { %v617_v15 = vadd.f32 %v585_v40, %v2534_v31  ;;  %v2565_v16 = vadd.f32 %v486_v41, %v2326_v58  ;;  %v1734_v4 = vpack.c.bf16 %v772_v61, %v770_v25  ;;  %v1005_v3 = vxor.u32 %v973_v46, %v941_v36 }
 0x114   : > { %v1913_v39 = vpop.eup %1912  ;;  %v648_v19 = vmul.f32 0.7978846, %v616_v0  ;;  %v522_v18 = vmul.f32 %v2551_v2, %v2551_v2  ;;  %v1758_v20 = vpack.c.bf16 %v773_v9, %v771_v28  ;;  %v1035_v33 = vmul.u32 739982445, %v1003_v27 }
 0x115   : > { %v1915_v23 = vpop.eup %1914  ;;  %v649_v24 = vmul.f32 0.7978846, %v617_v15  ;;  %v523_v26 = vmul.f32 %v2565_v16, %v2565_v16  ;;  %1735 = vmatmul.msk.bf16.gmra.mxu2 %vm2557_vm0, %v1734_v4  ;;  %v710_v50 = vadd.f32 1.0, %v1913_v39  ;;  %v1037_v38 = vmul.u32 739982445, %v1005_v3 }
 0x116   : > { %1916 = vtanh.f32 %v648_v19  ;;  %v554_v25 = vmul.f32 %v522_v18, %v2551_v2  ;;  %1759 = vmatmul.msk.bf16.gmra.mxu3 %vm1757_vm1, %v1758_v20  ;;  %v711_v7 = vadd.f32 1.0, %v1915_v23  ;;  %v942_v43 = vxor.u32 %v2320_v54, %v906_v62 }
 0x117   : > { %1918 = vtanh.f32 %v649_v24  ;;  %v555_v30 = vmul.f32 %v523_v26, %v2565_v16  ;;  %v742_v34 = vmul.f32 0.5, %v710_v50  ;;  %v1643_v32 = vxor.u32 2147483648, %v1035_v33 }
 0x118   : > { %v586_v28 = vmul.f32 0.044715, %v554_v25  ;;  %v743_v42 = vmul.f32 0.5, %v711_v7  ;;  %v1645_v52 = vxor.u32 2147483648, %v1037_v38  ;;  %v972_v53 = vshrl.u32 %v940_v5, 15 }
 0x119   : > { %v587_v8 = vmul.f32 0.044715, %v555_v30  ;;  %v439_v37 = vpop.f32.mrf.mxu0  ;;  %v774_v47 = vmul.f32 %v742_v34, %v2487_v48  ;;  %vm1093_vm2 = vcmp.lt.s32.totalorder %v1643_v32, 1717986918  ;;  %v974_v35 = vshrl.u32 %v942_v43, 15 }
 0x11a   : > { %v618_v45 = vadd.f32 %v586_v28, %v2551_v2  ;;  %v2587_v13 = vadd.f32 %v439_v37, %v2322_v55  ;;  %v488_v14 = vpop.f32.mrf.mxu1  ;;  %vm1099_vm3 = vcmp.lt.s32.totalorder %v1645_v52, 1717986918  ;;  %v1004_v41 = vxor.u32 %v972_v53, %v940_v5 }
 0x11b   : > { %v619_v12 = vadd.f32 %v587_v8, %v2565_v16  ;;  %v2592_v51 = vadd.f32 %v488_v14, %v2326_v58  ;;  %v1006_v11 = vxor.u32 %v974_v35, %v942_v43  ;;  %v775_v36 = vmul.f32 %v743_v42, %v2500_v57  ;;  %vm1736_vm4 = vmpackc.low %vm1099_vm3, %vm1093_vm2 }
 0x11c   : > { %v1917_v44 = vpop.eup %1916  ;;  %v650_v56 = vmul.f32 0.7978846, %v618_v45  ;;  %v524_v59 = vmul.f32 %v2587_v13, %v2587_v13  ;;  %v1036_v39 = vmul.u32 739982445, %v1004_v41  ;;  %v859_v23 = vmul.u32 2654435761, %v2547_v63 }
 0x11d   : > { %v1919_v40 = vpop.eup %1918  ;;  %v651_v60 = vmul.f32 0.7978846, %v619_v12  ;;  %v525_v48 = vmul.f32 %v2592_v51, %v2592_v51  ;;  %v712_v61 = vadd.f32 1.0, %v1917_v44  ;;  %v1038_v21 = vmul.u32 739982445, %v1006_v11 }
 0x11e   : > { %1920 = vtanh.f32 %v650_v56  ;;  %v556_v62 = vmul.f32 %v524_v59, %v2587_v13  ;;  %v713_v0 = vadd.f32 1.0, %v1919_v40  ;;  %v1644_v57 = vxor.u32 2147483648, %v1036_v39 }
 0x11f   : > { %1922 = vtanh.f32 %v651_v60  ;;  %v557_v6 = vmul.f32 %v525_v48, %v2592_v51  ;;  %v744_v9 = vmul.f32 0.5, %v712_v61  ;;  %v1646_v7 = vxor.u32 2147483648, %v1038_v21 }
 0x120   : > { %v588_v15 = vmul.f32 0.044715, %v556_v62  ;;  %v745_v4 = vmul.f32 0.5, %v713_v0  ;;  %vm1096_vm5 = vcmp.lt.s32.totalorder %v1644_v57, 1717986918  ;;  %v875_v38 = vshrl.u32 %v859_v23, 16 }
 0x121   : > { %v589_v19 = vmul.f32 0.044715, %v557_v6  ;;  %v442_v18 = vpop.f32.mrf.mxu0  ;;  %v776_v20 = vmul.f32 %v744_v9, %v2529_v29  ;;  %vm1102_vm6 = vcmp.lt.s32.totalorder %v1646_v7, 1717986918  ;;  %v860_v37 = vmul.u32 2654435761, %v2582_v1 }
 0x122   : > { %v620_v24 = vadd.f32 %v588_v15, %v2587_v13  ;;  %v2605_v26 = vadd.f32 %v442_v18, %v2322_v55  ;;  %v491_v50 = vpop.f32.mrf.mxu1  ;;  %v777_v46 = vmul.f32 %v745_v4, %v2534_v31  ;;  %vm1760_vm7 = vmpackc.low %vm1102_vm6, %vm1096_vm5  ;;  %v891_v32 = vxor.u32 %v875_v38, %v859_v23 }
 0x123   : > { %v621_v25 = vadd.f32 %v589_v19, %v2592_v51  ;;  %v2612_v27 = vadd.f32 %v491_v50, %v2326_v58  ;;  %v1737_v29 = vpack.c.bf16 %v776_v20, %v774_v47  ;;  %v876_v47 = vshrl.u32 %v860_v37, 16 }
 0x124   : > { %v1921_v63 = vpop.eup %1920  ;;  %v652_v30 = vmul.f32 0.7978846, %v620_v24  ;;  %v526_v34 = vmul.f32 %v2605_v26, %v2605_v26  ;;  %v1761_v3 = vpack.c.bf16 %v777_v46, %v775_v36  ;;  %v807_v53 = vadd.s32 80, %v2295_v10 }
 0x125   : > { %v1923_v28 = vpop.eup %1922  ;;  %v653_v33 = vmul.f32 0.7978846, %v621_v25  ;;  %v527_v31 = vmul.f32 %v2612_v27, %v2612_v27  ;;  %1738 = vmatmul.msk.bf16.gmra.mxu2 %vm1736_vm4, %v1737_v29  ;;  %v714_v5 = vadd.f32 1.0, %v1921_v63  ;;  %v892_v59 = vxor.u32 %v876_v47, %v860_v37 }
 0x126   : > { %1924 = vtanh.f32 %v652_v30  ;;  %v558_v8 = vmul.f32 %v526_v34, %v2605_v26  ;;  %1762 = vmatmul.msk.bf16.gmra.mxu3 %vm1760_vm7, %v1761_v3  ;;  %v715_v45 = vadd.f32 1.0, %v1923_v28  ;;  %v907_v1 = vmul.u32 2146121005, %v891_v32 }
 0x127   : > { %1926 = vtanh.f32 %v653_v33  ;;  %v559_v42 = vmul.f32 %v527_v31, %v2612_v27  ;;  %v746_v43 = vmul.f32 0.5, %v714_v5  ;;  %v808_v35 = vadd.s32 88, %v2295_v10 }
 0x128   : > { %v590_v14 = vmul.f32 0.044715, %v558_v8  ;;  %v747_v61 = vmul.f32 0.5, %v715_v45  ;;  %v908_v6 = vmul.u32 2146121005, %v892_v59  ;;  %v943_v9 = vxor.u32 %v2316_v49, %v907_v1 }
 0x129   : > { %v591_v12 = vmul.f32 0.044715, %v559_v42  ;;  %v444_v52 = vpop.f32.mrf.mxu0  ;;  %v2631_v48 = vmul.f32 %v746_v43, %v2551_v2  ;;  %v944_v36 = vxor.u32 %v2320_v54, %v907_v1  ;;  %v824_v2 = vadd.s32 %v2304_v17, %v807_v53 }
 0x12a   : > { %v2623_v44 = vadd.f32 %v444_v52, %v2322_v55  ;;  %v493_v56 = vpop.f32.mrf.mxu1  ;;  %v622_v40 = vadd.f32 %v590_v14, %v2605_v26  ;;  %v945_v19 = vxor.u32 %v2316_v49, %v908_v6  ;;  %v975_v18 = vshrl.u32 %v943_v9, 15 }
 0x12b   : > { %v2628_v60 = vadd.f32 %v493_v56, %v2326_v58  ;;  %v623_v0 = vadd.f32 %v591_v12, %v2612_v27  ;;  %v825_v20 = vadd.s32 %v2304_v17, %v808_v35  ;;  %v946_v34 = vxor.u32 %v2320_v54, %v908_v6 }
 0x12c   : > { %v1925_v62 = vpop.eup %1924  ;;  %v528_v41 = vmul.f32 %v2623_v44, %v2623_v44  ;;  %v654_v21 = vmul.f32 0.7978846, %v622_v40  ;;  %v977_v25 = vshrl.u32 %v945_v19, 15  ;;  %v1007_v29 = vxor.u32 %v975_v18, %v943_v9 }
 0x12d   : > { %v1927_v11 = vpop.eup %1926  ;;  %v529_v15 = vmul.f32 %v2628_v60, %v2628_v60  ;;  %v716_v4 = vadd.f32 1.0, %v1925_v62  ;;  %v655_v46 = vmul.f32 0.7978846, %v623_v0  ;;  %v976_v3 = vshrl.u32 %v944_v36, 15 }
 0x12e   : > { %v560_v39 = vmul.f32 %v528_v41, %v2623_v44  ;;  %v717_v50 = vadd.f32 1.0, %v1927_v11  ;;  %v1009_v5 = vxor.u32 %v977_v25, %v945_v19  ;;  %v1039_v8 = vmul.u32 739982445, %v1007_v29 }
 0x12f   : > { %v561_v23 = vmul.f32 %v529_v15, %v2628_v60  ;;  %v748_v24 = vmul.f32 0.5, %v716_v4  ;;  %1928 = vtanh.f32 %v654_v21  ;;  %v978_v12 = vshrl.u32 %v946_v34, 15 }
 0x130   : > { %v592_v57 = vmul.f32 0.044715, %v560_v39  ;;  %v749_v42 = vmul.f32 0.5, %v717_v50  ;;  %v1041_v45 = vmul.u32 739982445, %v1009_v5  ;;  %v1647_v14 = vxor.u32 2147483648, %v1039_v8 }
 0x131   : > { %v593_v7 = vmul.f32 0.044715, %v561_v23  ;;  %v447_v63 = vpop.f32.mrf.mxu0  ;;  %v780_v30 = vmul.f32 %v748_v24, %v2587_v13  ;;  %v1008_v52 = vxor.u32 %v976_v3, %v944_v36  ;;  %v1010_v1 = vxor.u32 %v978_v12, %v946_v34 }
 0x132   : > { %v624_v28 = vadd.f32 %v592_v57, %v2623_v44  ;;  %v2649_v33 = vadd.f32 %v447_v63, %v2322_v55  ;;  %v496_v31 = vpop.f32.mrf.mxu1  ;;  %vm1105_vm8 = vcmp.lt.s32.totalorder %v1647_v14, 1717986918  ;;  %v1649_v56 = vxor.u32 2147483648, %v1041_v45 }
 0x133   : > { %v625_v37 = vadd.f32 %v593_v7, %v2628_v60  ;;  %v2653_v38 = vadd.f32 %v496_v31, %v2326_v58  ;;  %v1740_v32 = vpack.c.bf16 %v780_v30, %v2631_v48  ;;  %v781_v59 = vmul.f32 %v749_v42, %v2592_v51 }
 0x134   : > { %v656_v43 = vmul.f32 0.7978846, %v624_v28  ;;  %v530_v13 = vmul.f32 %v2649_v33, %v2649_v33  ;;  %v1040_v35 = vmul.u32 739982445, %v1008_v52  ;;  %vm1111_vm9 = vcmp.lt.s32.totalorder %v1649_v56, 1717986918 }
 0x135   : > { %v657_v47 = vmul.f32 0.7978846, %v625_v37  ;;  %v531_v40 = vmul.f32 %v2653_v38, %v2653_v38  ;;  %v779_v62 = vmul.f32 %v747_v61, %v2565_v16  ;;  %v1929_v0 = vpop.eup %1928  ;;  %vm1739_vm10 = vmpackc.low %vm1111_vm9, %vm1105_vm8  ;;  %v1042_v41 = vmul.u32 739982445, %v1010_v1 }
 0x136   : > { %1930 = vtanh.f32 %v656_v43  ;;  %v562_v53 = vmul.f32 %v530_v13, %v2649_v33  ;;  %v1648_v6 = vxor.u32 2147483648, %v1040_v35  ;;  %v845_v11 = vadd.s32 %v2309_v22, %v824_v2  ;;  %1741 = vmatmul.msk.bf16.gmra.mxu2 %vm1739_vm10, %v1740_v32 }
 0x137   : > { %1932 = vtanh.f32 %v657_v47  ;;  %v846_v4 = vadd.s32 %v2309_v22, %v825_v20  ;;  %v1650_v36 = vxor.u32 2147483648, %v1042_v41  ;;  %v1764_v39 = vpack.c.bf16 %v781_v59, %v779_v62 }
 0x138   : > { %v594_v48 = vmul.f32 0.044715, %v562_v53  ;;  %1934 = vtanh.f32 %v655_v46  ;;  %vm1108_vm11 = vcmp.lt.s32.totalorder %v1648_v6, 1717986918  ;;  %v563_v19 = vmul.f32 %v531_v40, %v2653_v38 }
 0x139   : > { %v449_v9 = vpop.f32.mrf.mxu0  ;;  %v861_v18 = vmul.u32 2654435761, %v845_v11  ;;  %vm1114_vm12 = vcmp.lt.s32.totalorder %v1650_v36, 1717986918  ;;  %v718_v20 = vadd.f32 1.0, %v1929_v0 }
 0x13a   : > { %v2665_v51 = vadd.f32 %v449_v9, %v2322_v55  ;;  %v498_v15 = vpop.f32.mrf.mxu1  ;;  %v626_v21 = vadd.f32 %v594_v48, %v2649_v33  ;;  %vm1763_vm13 = vmpackc.low %vm1114_vm12, %vm1108_vm11  ;;  %v862_v57 = vmul.u32 2654435761, %v846_v4  ;;  %v595_v7 = vmul.f32 0.044715, %v563_v19 }
 0x13b   : > { %v2669_v16 = vadd.f32 %v498_v15, %v2326_v58  ;;  %v877_v25 = vshrl.u32 %v861_v18, 16  ;;  %1765 = vmatmul.msk.bf16.gmra.mxu3 %vm1763_vm13, %v1764_v39  ;;  %v750_v5 = vmul.f32 0.5, %v718_v20  ;;  %v809_v4 = vadd.s32 96, %v2295_v10 }
 0x13c   : > { %v1931_v61 = vpop.eup %1930  ;;  %v532_v2 = vmul.f32 %v2665_v51, %v2665_v51  ;;  %v878_v30 = vshrl.u32 %v862_v57, 16  ;;  %v658_v3 = vmul.f32 0.7978846, %v626_v21  ;;  %v627_v32 = vadd.f32 %v595_v7, %v2653_v38 }
 0x13d   : > { %v533_v23 = vmul.f32 %v2669_v16, %v2669_v16  ;;  %v1933_v24 = vpop.eup %1932  ;;  %v720_v46 = vadd.f32 1.0, %v1931_v61  ;;  %v893_v34 = vxor.u32 %v877_v25, %v861_v18  ;;  %v782_v59 = vmul.f32 %v750_v5, %v2605_v26 }
 0x13e   : > { %v564_v50 = vmul.f32 %v532_v2, %v2665_v51  ;;  %v1935_v29 = vpop.eup %1934  ;;  %v721_v8 = vadd.f32 1.0, %v1933_v24  ;;  %v894_v13 = vxor.u32 %v878_v30, %v862_v57  ;;  %1936 = vtanh.f32 %v658_v3 }
 0x13f   : > { %v565_v63 = vmul.f32 %v533_v23, %v2669_v16  ;;  %v752_v43 = vmul.f32 0.5, %v720_v46  ;;  %v909_v45 = vmul.u32 2146121005, %v893_v34  ;;  %v719_v47 = vadd.f32 1.0, %v1935_v29 }
 0x140   : > { %v596_v28 = vmul.f32 0.044715, %v564_v50  ;;  %v910_v52 = vmul.u32 2146121005, %v894_v13  ;;  %v753_v1 = vmul.f32 0.5, %v721_v8 }
 0x141   : > { %v452_v31 = vpop.f32.mrf.mxu0  ;;  %v597_v12 = vmul.f32 0.044715, %v565_v63  ;;  %v947_v53 = vxor.u32 %v2316_v49, %v909_v45  ;;  %v784_v40 = vmul.f32 %v752_v43, %v2623_v44  ;;  %v751_v41 = vmul.f32 0.5, %v719_v47 }
 0x142   : > { %v2680_v37 = vadd.f32 %v452_v31, %v2322_v55  ;;  %v501_v42 = vpop.f32.mrf.mxu1  ;;  %v628_v56 = vadd.f32 %v596_v28, %v2665_v51  ;;  %v949_v62 = vxor.u32 %v2316_v49, %v910_v52  ;;  %v948_v6 = vxor.u32 %v2320_v54, %v909_v45 }
 0x143   : > { %v2683_v14 = vadd.f32 %v501_v42, %v2326_v58  ;;  %v979_v0 = vshrl.u32 %v947_v53, 15  ;;  %v950_v9 = vxor.u32 %v2320_v54, %v910_v52  ;;  %v629_v11 = vadd.f32 %v597_v12, %v2669_v16 }
 0x144   : > { %v534_v35 = vmul.f32 %v2680_v37, %v2680_v37  ;;  %v981_v26 = vshrl.u32 %v949_v62, 15  ;;  %v660_v36 = vmul.f32 0.7978846, %v628_v56  ;;  %v785_v44 = vmul.f32 %v753_v1, %v2628_v60  ;;  %v1937_v24 = vpop.eup %1936 }
 0x145   : > { %v535_v48 = vmul.f32 %v2683_v14, %v2683_v14  ;;  %v1011_v15 = vxor.u32 %v979_v0, %v947_v53  ;;  %v980_v39 = vshrl.u32 %v948_v6, 15  ;;  %v982_v61 = vshrl.u32 %v950_v9, 15 }
 0x146   : > { %v566_v2 = vmul.f32 %v534_v35, %v2680_v37  ;;  %v1013_v18 = vxor.u32 %v981_v26, %v949_v62  ;;  %v1743_v7 = vpack.c.bf16 %v784_v40, %v782_v59  ;;  %v783_v63 = vmul.f32 %v751_v41, %v2612_v27 }
 0x147   : > { %v1043_v21 = vmul.u32 739982445, %v1011_v15  ;;  %v567_v50 = vmul.f32 %v535_v48, %v2683_v14  ;;  %v1012_v46 = vxor.u32 %v980_v39, %v948_v6  ;;  %v1014_v57 = vxor.u32 %v982_v61, %v950_v9 }
 0x148   : > { %v1045_v60 = vmul.u32 739982445, %v1013_v18  ;;  %1938 = vtanh.f32 %v660_v36  ;;  %v598_v3 = vmul.f32 0.044715, %v566_v2  ;;  %v1767_v31 = vpack.c.bf16 %v785_v44, %v783_v63 }
 0x149   : > { %v454_v19 = vpop.f32.mrf.mxu0  ;;  %v1651_v29 = vxor.u32 2147483648, %v1043_v21  ;;  %v1044_v30 = vmul.u32 739982445, %v1012_v46  ;;  %v1046_v34 = vmul.u32 739982445, %v1014_v57  ;;  %v826_v45 = vadd.s32 %v2304_v17, %v809_v4 }
 0x14a   : > { %v2702_v23 = vadd.f32 %v454_v19, %v2322_v55  ;;  %v503_v20 = vpop.f32.mrf.mxu1  ;;  %v1653_v28 = vxor.u32 2147483648, %v1045_v60  ;;  %v599_v5 = vmul.f32 0.044715, %v567_v50  ;;  %v659_v43 = vmul.f32 0.7978846, %v627_v32 }
 0x14b   : > { %v2706_v25 = vadd.f32 %v503_v20, %v2326_v58  ;;  %vm1117_vm14 = vcmp.lt.s32.totalorder %v1651_v29, 1717986918  ;;  %v1652_v8 = vxor.u32 2147483648, %v1044_v30  ;;  %v1654_v42 = vxor.u32 2147483648, %v1046_v34 }
 0x14c   : > { %v536_v55 = vmul.f32 %v2702_v23, %v2702_v23  ;;  %v661_v13 = vmul.f32 0.7978846, %v629_v11  ;;  %vm1123_vm15 = vcmp.lt.s32.totalorder %v1653_v28, 1717986918  ;;  %v630_v47 = vadd.f32 %v598_v3, %v2680_v37 }
 0x14d   : > { %v537_v58 = vmul.f32 %v2706_v25, %v2706_v25  ;;  %vm1742_vm0 = vmpackc.low %vm1123_vm15, %vm1117_vm14  ;;  %vm1120_vm1 = vcmp.lt.s32.totalorder %v1652_v8, 1717986918  ;;  %vm1126_vm2 = vcmp.lt.s32.totalorder %v1654_v42, 1717986918  ;;  %v810_v12 = vadd.s32 104, %v2295_v10 }
 0x14e   : > { %v568_v27 = vmul.f32 %v536_v55, %v2702_v23  ;;  %1744 = vmatmul.msk.bf16.gmra.mxu2 %vm1742_vm0, %v1743_v7  ;;  %vm1766_vm3 = vmpackc.low %vm1126_vm2, %vm1120_vm1  ;;  %v1939_v52 = vpop.eup %1938  ;;  %v631_v53 = vadd.f32 %v599_v5, %v2683_v14  ;;  %v847_v56 = vadd.s32 %v2309_v22, %v826_v45  ;;  %1940 = vtanh.f32 %v661_v13 }
 0x14f   : > { %1768 = vmatmul.msk.bf16.gmra.mxu3 %vm1766_vm3, %v1767_v31  ;;  %v569_v32 = vmul.f32 %v537_v58, %v2706_v25  ;;  %v722_v59 = vadd.f32 1.0, %v1937_v24  ;;  %v827_v1 = vadd.s32 %v2304_v17, %v810_v12  ;;  %v811_v35 = vadd.s32 112, %v2295_v10 }
 0x150   : > { %1942 = vtanh.f32 %v659_v43  ;;  %v600_v40 = vmul.f32 0.044715, %v568_v27  ;;  %v863_v62 = vmul.u32 2654435761, %v847_v56  ;;  %v662_v0 = vmul.f32 0.7978846, %v630_v47 }
 0x151   : > { %v848_v48 = vadd.s32 %v2309_v22, %v827_v1  ;;  %v663_v41 = vmul.f32 0.7978846, %v631_v53  ;;  %v601_v6 = vmul.f32 0.044715, %v569_v32  ;;  %v724_v9 = vadd.f32 1.0, %v1939_v52 }
 0x152   : > { %v879_v11 = vshrl.u32 %v863_v62, 16  ;;  %v754_v26 = vmul.f32 0.5, %v722_v59  ;;  %v812_v4 = vadd.s32 120, %v2295_v10  ;;  %v828_v36 = vadd.s32 %v2304_v17, %v811_v35 }
 0x153   : > { %v864_v15 = vmul.u32 2654435761, %v848_v48  ;;  %v632_v44 = vadd.f32 %v600_v40, %v2702_v23  ;;  %1944 = vtanh.f32 %v662_v0  ;;  %v633_v20 = vadd.f32 %v601_v6, %v2706_v25 }
 0x154   : > { %v895_v39 = vxor.u32 %v879_v11, %v863_v62  ;;  %v1941_v61 = vpop.eup %1940  ;;  %v829_v2 = vadd.s32 %v2304_v17, %v812_v4  ;;  %v849_v18 = vadd.s32 %v2309_v22, %v828_v36  ;;  %1946 = vtanh.f32 %v663_v41 }
 0x155   : > { %v880_v19 = vshrl.u32 %v864_v15, 16  ;;  %v756_v24 = vmul.f32 0.5, %v724_v9  ;;  %v2730_v10 = vmul.f32 %v754_v26, %v2649_v33  ;;  %v664_v29 = vmul.f32 0.7978846, %v632_v44 }
 0x156   : > { %v1943_v21 = vpop.eup %1942  ;;  %v911_v50 = vmul.u32 2146121005, %v895_v39  ;;  %v850_v57 = vadd.s32 %v2309_v22, %v829_v2  ;;  %v865_v60 = vmul.u32 2654435761, %v849_v18  ;;  %v725_v63 = vadd.f32 1.0, %v1941_v61 }
 0x157   : > { %v896_v46 = vxor.u32 %v880_v19, %v864_v15  ;;  %v723_v34 = vadd.f32 1.0, %v1943_v21  ;;  %v665_v28 = vmul.f32 0.7978846, %v633_v20  ;;  %v788_v31 = vmul.f32 %v756_v24, %v2665_v51 }
 0x158   : > { %v951_v7 = vxor.u32 %v2316_v49, %v911_v50  ;;  %v952_v17 = vxor.u32 %v2320_v54, %v911_v50  ;;  %v866_v55 = vmul.u32 2654435761, %v850_v57  ;;  %v881_v3 = vshrl.u32 %v865_v60, 16 }
 0x159   : > { %v912_v30 = vmul.u32 2146121005, %v896_v46  ;;  %v1945_v8 = vpop.eup %1944  ;;  %1948 = vtanh.f32 %v664_v29  ;;  %v757_v45 = vmul.f32 0.5, %v725_v63  ;;  %v755_v56 = vmul.f32 0.5, %v723_v34 }
 0x15a   : > { %v983_v5 = vshrl.u32 %v951_v7, 15  ;;  %v984_v33 = vshrl.u32 %v952_v17, 15  ;;  %v882_v58 = vshrl.u32 %v866_v55, 16  ;;  %v897_v43 = vxor.u32 %v881_v3, %v865_v60  ;;  %v1947_v13 = vpop.eup %1946 }
 0x15b   : > { %v953_v42 = vxor.u32 %v2316_v49, %v912_v30  ;;  %v954_v22 = vxor.u32 %v2320_v54, %v912_v30  ;;  %1950 = vtanh.f32 %v665_v28  ;;  %v789_v48 = vmul.f32 %v757_v45, %v2669_v16 }
 0x15c   : > { %v1015_v27 = vxor.u32 %v983_v5, %v951_v7  ;;  %v1016_v47 = vxor.u32 %v984_v33, %v952_v17  ;;  %v898_v53 = vxor.u32 %v882_v58, %v866_v55  ;;  %v913_v32 = vmul.u32 2146121005, %v897_v43 }
 0x15d   : > { %v985_v12 = vshrl.u32 %v953_v42, 15  ;;  %v986_v52 = vshrl.u32 %v954_v22, 15  ;;  %v1746_v36 = vpack.c.bf16 %v788_v31, %v2730_v10  ;;  %v787_v44 = vmul.f32 %v755_v56, %v2653_v38 }
 0x15e   : > { %v1047_v51 = vmul.u32 739982445, %v1015_v27  ;;  %v1048_v59 = vmul.u32 739982445, %v1016_v47  ;;  %v914_v40 = vmul.u32 2146121005, %v898_v53  ;;  %v955_v62 = vxor.u32 %v2316_v49, %v913_v32 }
 0x15f   : > { %v1017_v1 = vxor.u32 %v985_v12, %v953_v42  ;;  %v1018_v35 = vxor.u32 %v986_v52, %v954_v22  ;;  %v956_v6 = vxor.u32 %v2320_v54, %v913_v32  ;;  %v1949_v4 = vpop.eup %1948  ;;  %v1770_v21 = vpack.c.bf16 %v789_v48, %v787_v44 }
 0x160   : > { %v1655_v0 = vxor.u32 2147483648, %v1047_v51  ;;  %v1656_v41 = vxor.u32 2147483648, %v1048_v59  ;;  %v957_v26 = vxor.u32 %v2316_v49, %v914_v40  ;;  %v987_v15 = vshrl.u32 %v955_v62, 15 }
 0x161   : > { %v1049_v9 = vmul.u32 739982445, %v1017_v1  ;;  %v1050_v11 = vmul.u32 739982445, %v1018_v35  ;;  %v958_v39 = vxor.u32 %v2320_v54, %v914_v40  ;;  %v988_v61 = vshrl.u32 %v956_v6, 15  ;;  %v1951_v18 = vpop.eup %1950 }
 0x162   : > { %vm1129_vm4 = vcmp.lt.s32.totalorder %v1655_v0, 1717986918  ;;  %v989_v16 = vshrl.u32 %v957_v26, 15  ;;  %vm1132_vm5 = vcmp.lt.s32.totalorder %v1656_v41, 1717986918  ;;  %v1019_v49 = vxor.u32 %v987_v15, %v955_v62 }
 0x163   : > { %v1657_v19 = vxor.u32 2147483648, %v1049_v9  ;;  %v1658_v2 = vxor.u32 2147483648, %v1050_v11  ;;  %v990_v20 = vshrl.u32 %v958_v39, 15  ;;  %v1020_v50 = vxor.u32 %v988_v61, %v956_v6 }
 0x164   : > { %v1021_v24 = vxor.u32 %v989_v16, %v957_v26  ;;  %v728_v38 = vadd.f32 1.0, %v1949_v4  ;;  %v729_v54 = vadd.f32 1.0, %v1951_v18  ;;  %v726_v46 = vadd.f32 1.0, %v1945_v8  ;;  %v2750_v8 = vld [vmem:[%s2830_s5] ss:$0 sm:$0xff] }
 0x165   : > { %vm1135_vm6 = vcmp.lt.s32.totalorder %v1657_v19, 1717986918  ;;  %vm1138_vm7 = vcmp.lt.s32.totalorder %v1658_v2, 1717986918  ;;  %v1022_v10 = vxor.u32 %v990_v20, %v958_v39  ;;  %v1051_v57 = vmul.u32 739982445, %v1019_v49 }
 0x166   : > { %vm1745_vm8 = vmpackc.low %vm1135_vm6, %vm1129_vm4  ;;  %v1053_v60 = vmul.u32 739982445, %v1021_v24  ;;  %v727_v29 = vadd.f32 1.0, %v1947_v13  ;;  %v1052_v7 = vmul.u32 739982445, %v1020_v50  ;;  %v760_v17 = vmul.f32 0.5, %v728_v38 }
 0x167   : > { %1747 = vmatmul.msk.bf16.gmra.mxu2 %vm1745_vm8, %v1746_v36  ;;  %vm1769_vm9 = vmpackc.low %vm1138_vm7, %vm1132_vm5  ;;  %v1054_v63 = vmul.u32 739982445, %v1022_v10  ;;  %v761_v30 = vmul.f32 0.5, %v729_v54  ;;  %v758_v34 = vmul.f32 0.5, %v726_v46  ;;  %v1659_v55 = vxor.u32 2147483648, %v1051_v57 }
 0x168   : > { %1771 = vmatmul.msk.bf16.gmra.mxu3 %vm1769_vm9, %v1770_v21  ;;  %v1661_v3 = vxor.u32 2147483648, %v1053_v60  ;;  %v759_v28 = vmul.f32 0.5, %v727_v29  ;;  %v1660_v31 = vxor.u32 2147483648, %v1052_v7  ;;  %v792_v33 = vmul.f32 %v760_v17, %v2702_v23 }
 0x169   : > { %v1662_v5 = vxor.u32 2147483648, %v1054_v63  ;;  %v793_v42 = vmul.f32 %v761_v30, %v2706_v25  ;;  %v790_v22 = vmul.f32 %v758_v34, %v2680_v37  ;;  %vm1141_vm10 = vcmp.lt.s32.totalorder %v1659_v55, 1717986918 }
 0x16a   : > { %vm1147_vm11 = vcmp.lt.s32.totalorder %v1661_v3, 1717986918  ;;  %v791_v58 = vmul.f32 %v759_v28, %v2683_v14  ;;  %vm1144_vm12 = vcmp.lt.s32.totalorder %v1660_v31, 1717986918 }
 0x16b   : > { %vm1150_vm13 = vcmp.lt.s32.totalorder %v1662_v5, 1717986918  ;;  %v1749_v43 = vpack.c.bf16 %v792_v33, %v790_v22  ;;  %vm1748_vm14 = vmpackc.low %vm1147_vm11, %vm1141_vm10 }
 0x16c   : > { %v1773_v23 = vpack.c.bf16 %v793_v42, %v791_v58  ;;  %vm1772_vm15 = vmpackc.low %vm1150_vm13, %vm1144_vm12 }
 0x177   : > { %1750 = vmatmul.msk.bf16.gmra.mxu2 %vm1748_vm14, %v1749_v43 }
 0x178   : > { %v1340_v13 = vpop.f32.mrf.mxu2  ;;  %1774 = vmatmul.msk.bf16.gmra.mxu3 %vm1772_vm15, %v1773_v23 }
 0x179   : > { %v1341_v25 = vadd.f32 %v2750_v8, %v1340_v13  ;;  %v1389_v27 = vpop.f32.mrf.mxu3 }
 0x17b   : > { %v1390_v45 = vadd.f32 %v1389_v27, %v1341_v25 }
 0x17d   : > { %1429 = vst [vmem:[%s2757_s12] sm:$0xff] %v1390_v45 }
 0x180   : > { %v1342_v37 = vpop.f32.mrf.mxu2 }
 0x181   : > { %v1343_v14 = vadd.f32 %v2750_v8, %v1342_v37  ;;  %v1391_v47 = vpop.f32.mrf.mxu3 }
 0x183   : > { %v1392_v12 = vadd.f32 %v1391_v47, %v1343_v14 }
 0x185   : > { %1430 = vst [vmem:[%s2757_s12 + $0x8] sm:$0xff] %v1392_v12 }
 0x188   : > { %v1345_v52 = vpop.f32.mrf.mxu2 }
 0x189   : > { %v1346_v53 = vadd.f32 %v2750_v8, %v1345_v52  ;;  %v1394_v32 = vpop.f32.mrf.mxu3 }
 0x18b   : > { %v1395_v51 = vadd.f32 %v1394_v32, %v1346_v53 }
 0x18d   : > { %1431 = vst [vmem:[%s2757_s12 + $0x10] sm:$0xff] %v1395_v51 }
 0x190   : > { %v1347_v56 = vpop.f32.mrf.mxu2 }
 0x191   : > { %v1348_v59 = vadd.f32 %v2750_v8, %v1347_v56  ;;  %v1396_v1 = vpop.f32.mrf.mxu3 }
 0x193   : > { %v1397_v35 = vadd.f32 %v1396_v1, %v1348_v59 }
 0x195   : > { %1432 = vst [vmem:[%s2757_s12 + $0x18] sm:$0xff] %v1397_v35 }
 0x198   : > { %v1350_v40 = vpop.f32.mrf.mxu2 }
 0x199   : > { %v1351_v62 = vadd.f32 %v2750_v8, %v1350_v40  ;;  %v1399_v0 = vpop.f32.mrf.mxu3 }
 0x19b   : > { %v1400_v48 = vadd.f32 %v1399_v0, %v1351_v62 }
 0x19d   : > { %1433 = vst [vmem:[%s2757_s12 + $0x20] sm:$0xff] %v1400_v48 }
 0x1a0   : > { %v1352_v41 = vpop.f32.mrf.mxu2 }
 0x1a1   : > { %v1353_v6 = vadd.f32 %v2750_v8, %v1352_v41  ;;  %v1401_v9 = vpop.f32.mrf.mxu3 }
 0x1a3   : > { %v1402_v11 = vadd.f32 %v1401_v9, %v1353_v6 }
 0x1a5   : > { %1434 = vst [vmem:[%s2757_s12 + $0x28] sm:$0xff] %v1402_v11 }
 0x1a8   : > { %v1355_v26 = vpop.f32.mrf.mxu2 }
 0x1a9   : > { %v1356_v15 = vadd.f32 %v2750_v8, %v1355_v26  ;;  %v1404_v4 = vpop.f32.mrf.mxu3 }
 0x1ab   : > { %v1405_v36 = vadd.f32 %v1404_v4, %v1356_v15 }
 0x1ad   : > { %1435 = vst [vmem:[%s2757_s12 + $0x30] sm:$0xff] %v1405_v36 }
 0x1b0   : > { %v1357_v44 = vpop.f32.mrf.mxu2 }
 0x1b1   : > { %v1358_v39 = vadd.f32 %v2750_v8, %v1357_v44  ;;  %v1406_v61 = vpop.f32.mrf.mxu3 }
 0x1b3   : > { %v1407_v19 = vadd.f32 %v1406_v61, %v1358_v39 }
 0x1b5   : > { %1436 = vst [vmem:[%s2757_s12 + $0x38] sm:$0xff] %v1407_v19 }
 0x1b9   : > { %v1360_v2 = vpop.f32.mrf.mxu2 }
 0x1ba   : > { %v1361_v16 = vadd.f32 %v2750_v8, %v1360_v2 }
 0x1be   : > { %v1409_v18 = vpop.f32.mrf.mxu3 }
 0x1bf   : > { %v1410_v21 = vadd.f32 %v1409_v18, %v1361_v16 }
 0x1c1   : > { %1437 = vst [vmem:[%s2757_s12 + $0x40] sm:$0xff] %v1410_v21  ;;  %v1362_v20 = vpop.f32.mrf.mxu2 }
 0x1c2   : > { %v1363_v49 = vadd.f32 %v2750_v8, %v1362_v20 }
 0x1c6   : > { %v1411_v24 = vpop.f32.mrf.mxu3 }
 0x1c7   : > { %v1412_v50 = vadd.f32 %v1411_v24, %v1363_v49 }
 0x1c9   : > { %1438 = vst [vmem:[%s2757_s12 + $0x48] sm:$0xff] %v1412_v50 }
 0x1d1   : > { %v1365_v10 = vpop.f32.mrf.mxu2 }
 0x1d2   : > { %v1366_v38 = vadd.f32 %v2750_v8, %v1365_v10  ;;  %v1414_v54 = vpop.f32.mrf.mxu3 }
 0x1d4   : > { %v1415_v46 = vadd.f32 %v1414_v54, %v1366_v38 }
 0x1d6   : > { %1439 = vst [vmem:[%s2757_s12 + $0x50] sm:$0xff] %v1415_v46 }
 0x1d9   : > { %v1367_v57 = vpop.f32.mrf.mxu2 }
 0x1da   : > { %v1368_v60 = vadd.f32 %v2750_v8, %v1367_v57  ;;  %v1416_v29 = vpop.f32.mrf.mxu3 }
 0x1dc   : > { %v1417_v7 = vadd.f32 %v1416_v29, %v1368_v60 }
 0x1de   : > { %1440 = vst [vmem:[%s2757_s12 + $0x58] sm:$0xff] %v1417_v7 }
 0x1ea   : > { %v1370_v63 = vpop.f32.mrf.mxu2 }
 0x1eb   : > { %v1371_v17 = vadd.f32 %v2750_v8, %v1370_v63  ;;  %v1419_v30 = vpop.f32.mrf.mxu3 }
 0x1ed   : > { %v1420_v34 = vadd.f32 %v1419_v30, %v1371_v17 }
 0x1ef   : > { %1441 = vst [vmem:[%s2757_s12 + $0x60] sm:$0xff] %v1420_v34 }
 0x1f2   : > { %v1372_v55 = vpop.f32.mrf.mxu2 }
 0x1f3   : > { %v1373_v3 = vadd.f32 %v2750_v8, %v1372_v55  ;;  %v1421_v28 = vpop.f32.mrf.mxu3 }
 0x1f5   : > { %v1422_v31 = vadd.f32 %v1421_v28, %v1373_v3 }
 0x1f7   : > { %1442 = vst [vmem:[%s2757_s12 + $0x68] sm:$0xff] %v1422_v31 }
 0x1fa   : > { %v1375_v5 = vpop.f32.mrf.mxu2 }
 0x1fb   : > { %v1376_v33 = vadd.f32 %v2750_v8, %v1375_v5  ;;  %v1424_v42 = vpop.f32.mrf.mxu3 }
 0x1fd   : > { %v1425_v22 = vadd.f32 %v1424_v42, %v1376_v33 }
 0x1ff   : > { %1443 = vst [vmem:[%s2757_s12 + $0x70] sm:$0xff] %v1425_v22 }
 0x202   : > { %v1377_v58 = vpop.f32.mrf.mxu2 }
 0x203   : > { %v1378_v43 = vadd.f32 %v2750_v8, %v1377_v58  ;;  %v1426_v13 = vpop.f32.mrf.mxu3 }
 0x205   : > { %v1427_v23 = vadd.f32 %v1426_v13, %v1378_v43 }
 0x207   : > { %1444 = vst [vmem:[%s2757_s12 + $0x78] sm:$0xff] %v1427_v23 }
 0x208   : > { %2069 = shalt.err (!%p2066_p10)
}
 0x209   : > { %s2120_s17 = smov 128   ;;  %s2121_s22 = smov 8  }
 0x20a   : > { %1824 = dma.vmem_to_hbm [thread:$0]  (%p2232_p5), %s1459_s27, 2048, %s1461_s15, %s1446_s11, %s2120_s17, %s2120_s17, %s2121_s22  }
 0x20b PF: > { %s1475_s10 = sand.u32 1, %s2100_s23   ;;  %p2845_p12 = scmp.ge.s32.totalorder %s2112_s26, 2 }
 0x20c   : > { %s1476_s12 = scalar_lea.sflag [#allocation6], %s1475_s10 }
 0x20d   : > { %p1838_p13 = pnand %p2845_p12, %p2195_p6 }
 0x20f   : > { %p1839_p0 = pneg %p1838_p13 }
 0x211   : > { %2095 = dma.done.wait (%p1839_p0), %s1476_s12, 2048  }
 0x212   : > { %2097 = vsyncadd (%p1839_p0), %s1476_s12, 4294965248  ;;  %p21_p3 = scmp.ge.s32.totalorder %s2219_s21, 4   ;;  %s2846_s23 = smov %s2104_s24 }
 0x213   : > { %s2847_s24 = smov %s2108_s25  ;;  %s2848_s25 = smov %s2228_s30 }
 0x214   : > { %s2849_s26 = smov %s2219_s21  ;;  %23 = sbr.rel (!%p21_p3) target bundleno = 8 (0x8), region = 93 }
 0x219   :  { %1482 = vsyncpa [#allocation5], 1 }
 0x21a   :  { %1484 = vsyncpa [#allocation5 + $0x1], 1 }
 0x21b   :  { %1485 = vsyncpa [#allocation8], 1 }
 0x21c   :  { %1486 = vsyncpa [#allocation6], 1 }
 0x21d   :  { %1488 = vsyncpa [#allocation6 + $0x1], 1 }

</bundles_post_ra>
